<compile_context>
chip_gen: v7x
topology: tpu7x:2x2x1
jax: 0.10.0
libtpu: 0.0.40
codegen_flags: <defaults>
</compile_context>

<pallas_src>
import numpy as np
import jax
import jax.numpy as jnp
from jax.experimental import pallas as pl
from jax.experimental.pallas import tpu as pltpu


# ------------------------------ Pallas kernel ------------------------------ #

def fused_cnn_kernel(x_ref, c1m_ref, c1b_ref, e1_ref, s1_ref,
                     c2m_ref, c2b_ref, e2_ref, s2_ref,
                     fc1w_ref, fc1b_ref, fc2w_ref, fc2b_ref, o_ref):
    """Whole CNN forward for one sample (1x28x28).

    Activation layout: 2-D slabs with rows = height and lanes = channel*width,
    so convolutions are banded matmuls and 2x2 max-pool is a pair of exact
    0/1-selection matmuls per axis.  All intermediates stay in vregs/VMEM.
    """
    f32 = jnp.float32

    def mm(a, b):
        return jnp.dot(a, b, preferred_element_type=f32)

    # ---- conv1 (1->6, k=5, VALID) + bias + ReLU: (28,28) -> (24, 6*24) ----
    acc = mm(x_ref[0, 0:24, :], c1m_ref[0])
    for kh in range(1, 5):
        acc = acc + mm(x_ref[0, kh:kh + 24, :], c1m_ref[kh])
    y1 = jnp.maximum(acc + c1b_ref[...], 0.0)                  # (24, 144)

    # ---- maxpool 2x2: width phases (lane selectors), then height phases ----
    h1 = jnp.maximum(mm(y1, e1_ref[0]), mm(y1, e1_ref[1]))     # (24, 72)
    p1 = jnp.maximum(mm(s1_ref[0], h1), mm(s1_ref[1], h1))     # (12, 72) = (h, 6*12)

    # ---- conv2 (6->8, k=3, VALID) + bias + ReLU: (12,72) -> (10, 8*10) ----
    acc2 = mm(p1[0:10, :], c2m_ref[0])
    for kh in range(1, 3):
        acc2 = acc2 + mm(p1[kh:kh + 10, :], c2m_ref[kh])
    y2 = jnp.maximum(acc2 + c2b_ref[...], 0.0)                 # (10, 80)

    # ---- maxpool 2x2 ----
    h2 = jnp.maximum(mm(y2, e2_ref[0]), mm(y2, e2_ref[1]))     # (10, 40)
    p2 = jnp.maximum(mm(s2_ref[0], h2), mm(s2_ref[1], h2))     # (5, 40) = (h, 8*5)

    # ---- fc1 + ReLU (NCHW flatten folded into the fc1 weight layout) ----
    h = fc1b_ref[...]                                          # (1, H1)
    for r in range(5):
        h = h + mm(p2[r:r + 1, :], fc1w_ref[r])                # (1,40) @ (40,H1)
    h = jnp.maximum(h, 0.0)

    # ---- fc2 + softmax(dim=1) ----
    logits = mm(h, fc2w_ref[...]) + fc2b_ref[...]              # (1, NC)
    m = jnp.max(logits, axis=-1, keepdims=True)
    e = jnp.exp(logits - m)
    s = jnp.sum(e, axis=-1, keepdims=True)
    inv = pl.reciprocal(s, approx=True)                        # EUP approx recip
    inv = inv * (2.0 - s * inv)                                # +1 Newton step -> ~f32 exact
    o_ref[0] = e * inv


# --------------------- host-side weight folding helpers -------------------- #

def _banded_conv_mats(w, in_w):
    """Fold im2col into the conv weights.

    w: (Cout, Cin, K, K).  Returns (K, Cin*in_w, Cout*out_w), out_w = in_w-K+1,
    with mats[kh, c*in_w + j + kw, d*out_w + j] = w[d, c, kh, kw] (VALID conv,
    cross-correlation as in nn.Conv2d)."""
    w = np.asarray(w, np.float32)
    cout, cin, K, _ = w.shape
    out_w = in_w - K + 1
    mats = np.zeros((K, cin * in_w, cout * out_w), np.float32)
    for kh in range(K):
        for d in range(cout):
            for c in range(cin):
                for j in range(out_w):
                    for kw in range(K):
                        mats[kh, c * in_w + j + kw, d * out_w + j] = w[d, c, kh, kw]
    return jnp.asarray(mats)


def _pool_lane_selectors(n_ch, in_w):
    """(2, n_ch*in_w, n_ch*(in_w//2)) 0/1 matrices picking even/odd columns per channel."""
    out_w = in_w // 2
    e = np.zeros((2, n_ch * in_w, n_ch * out_w), np.float32)
    for c in range(n_ch):
        for pj in range(out_w):
            e[0, c * in_w + 2 * pj, c * out_w + pj] = 1.0
            e[1, c * in_w + 2 * pj + 1, c * out_w + pj] = 1.0
    return jnp.asarray(e)


def _pool_row_selectors(in_h):
    """(2, in_h//2, in_h) 0/1 matrices picking even/odd rows."""
    out_h = in_h // 2
    s = np.zeros((2, out_h, in_h), np.float32)
    for pi in range(out_h):
        s[0, pi, 2 * pi] = 1.0
        s[1, pi, 2 * pi + 1] = 1.0
    return jnp.asarray(s)


# ------------------------------ forward wrapper ----------------------------- #

def cnn_forward(x_nchw, params):
    """Forward pass of CNNNetwork, fused into a single Pallas TPU kernel."""
    N, C, H, W = x_nchw.shape
    assert (C, H, W) == (1, 28, 28), "module's 8*5*5 flatten implies 1x28x28 inputs"
    x = x_nchw.reshape(N, 28, 28).astype(jnp.float32)

    # conv weights folded into banded matmul form; biases expanded lane-dense.
    c1m = _banded_conv_mats(params["conv1_w"], 28)                             # (5, 28, 144)
    c1b = jnp.asarray(np.repeat(np.asarray(params["conv1_b"], np.float32), 24)[None, :])
    c2m = _banded_conv_mats(params["conv2_w"], 12)                             # (3, 72, 80)
    c2b = jnp.asarray(np.repeat(np.asarray(params["conv2_b"], np.float32), 10)[None, :])

    e1 = _pool_lane_selectors(6, 24)     # (2, 144, 72)
    s1 = _pool_row_selectors(24)         # (2, 12, 24)
    e2 = _pool_lane_selectors(8, 10)     # (2, 80, 40)
    s2 = _pool_row_selectors(10)         # (2, 5, 10)

    # fc1: fold the PyTorch NCHW flatten (idx = c*25 + h*5 + w) into the weight
    # layout: fc1w[h, c*5 + w, h1] = fc1_w[h1, c*25 + h*5 + w].
    fc1_w = params["fc1_w"].astype(jnp.float32)
    H1 = fc1_w.shape[0]
    fc1w = jnp.transpose(fc1_w.reshape(H1, 8, 5, 5), (2, 1, 3, 0)).reshape(5, 40, H1)
    fc1b = params["fc1_b"].astype(jnp.float32).reshape(1, H1)
    fc2w = params["fc2_w"].astype(jnp.float32).T                               # (H1, NC)
    fc2b = params["fc2_b"].astype(jnp.float32).reshape(1, -1)
    NC = fc2w.shape[1]

    def resident(a):  # weight/constant block, identical for every grid step
        zeros = (0,) * a.ndim
        return pl.BlockSpec(a.shape, lambda b: zeros)

    out = pl.pallas_call(
        fused_cnn_kernel,
        out_shape=jax.ShapeDtypeStruct((N, 1, NC), jnp.float32),
        grid=(N,),
        in_specs=[pl.BlockSpec((1, 28, 28), lambda b: (b, 0, 0)),
                  resident(c1m), resident(c1b), resident(e1), resident(s1),
                  resident(c2m), resident(c2b), resident(e2), resident(s2),
                  resident(fc1w), resident(fc1b), resident(fc2w), resident(fc2b)],
        out_specs=pl.BlockSpec((1, 1, NC), lambda b: (b, 0, 0)),
        compiler_params=pltpu.CompilerParams(
            dimension_semantics=("parallel",)),   # v7x: batch split across 2 TCs
    )(x, c1m, c1b, e1, s1, c2m, c2b, e2, s2, fc1w, fc1b, fc2w, fc2b)
    return out.reshape(N, NC)


# ----------------------------- pure-JAX reference --------------------------- #

def reference_forward(x, params):
    def conv(x, w, b):
        y = jax.lax.conv_general_dilated(x, w, (1, 1), "VALID",
                                         dimension_numbers=("NCHW", "OIHW", "NCHW"))
        return y + b.reshape(1, -1, 1, 1)

    def pool(x):
        return jax.lax.reduce_window(x, -jnp.inf, jax.lax.max,
                                     (1, 1, 2, 2), (1, 1, 2, 2), "VALID")

    y = pool(jax.nn.relu(conv(x, params["conv1_w"], params["conv1_b"])))
    y = pool(jax.nn.relu(conv(y, params["conv2_w"], params["conv2_b"])))
    f = y.reshape(y.shape[0], -1)                                   # NCHW flatten
    h = jax.nn.relu(f @ params["fc1_w"].T + params["fc1_b"])
    logits = h @ params["fc2_w"].T + params["fc2_b"]
    return jax.nn.softmax(logits, axis=1)


# ---------------------------------- main ------------------------------------ #

if __name__ == "__main__":
    hidden_size1, num_classes, batch = 32, 10, 2

    key = jax.random.PRNGKey(0)
    ks = jax.random.split(key, 9)
    scale = 0.1
    params = {
        "conv1_w": scale * jax.random.normal(ks[0], (6, 1, 5, 5), jnp.float32),
        "conv1_b": scale * jax.random.normal(ks[1], (6,), jnp.float32),
        "conv2_w": scale * jax.random.normal(ks[2], (8, 6, 3, 3), jnp.float32),
        "conv2_b": scale * jax.random.normal(ks[3], (8,), jnp.float32),
        "fc1_w": scale * jax.random.normal(ks[4], (hidden_size1, 8 * 5 * 5), jnp.float32),
        "fc1_b": scale * jax.random.normal(ks[5], (hidden_size1,), jnp.float32),
        "fc2_w": scale * jax.random.normal(ks[6], (num_classes, hidden_size1), jnp.float32),
        "fc2_b": scale * jax.random.normal(ks[7], (num_classes,), jnp.float32),
    }
    # MNIST-style input: the module's 8*5*5 flatten implies 28x28 single-channel.
    x = jax.random.normal(ks[8], (batch, 1, 28, 28), jnp.float32)

    out = jax.block_until_ready(cnn_forward(x, params))
    ref = jax.block_until_ready(reference_forward(x, params))

    assert out.shape == (batch, num_classes)
    assert jnp.allclose(out, ref, rtol=1e-3, atol=1e-5), (
        f"max abs diff {float(jnp.max(jnp.abs(out - ref)))}")

    print("KERNEL_OK")
</pallas_src>

<mosaic_0001>
module attributes {stable_mosaic.version = 11 : i64} {
  func.func @fused_cnn_kernel(%arg0: i32, %arg1: memref<1x28x28xf32, #tpu.memory_space<vmem>>, %arg2: memref<5x28x144xf32, #tpu.memory_space<vmem>>, %arg3: memref<1x144xf32, #tpu.memory_space<vmem>>, %arg4: memref<2x144x72xf32, #tpu.memory_space<vmem>>, %arg5: memref<2x12x24xf32, #tpu.memory_space<vmem>>, %arg6: memref<3x72x80xf32, #tpu.memory_space<vmem>>, %arg7: memref<1x80xf32, #tpu.memory_space<vmem>>, %arg8: memref<2x80x40xf32, #tpu.memory_space<vmem>>, %arg9: memref<2x5x10xf32, #tpu.memory_space<vmem>>, %arg10: memref<5x40x32xf32, #tpu.memory_space<vmem>>, %arg11: memref<1x32xf32, #tpu.memory_space<vmem>>, %arg12: memref<32x10xf32, #tpu.memory_space<vmem>>, %arg13: memref<1x10xf32, #tpu.memory_space<vmem>>, %arg14: memref<1x1x10xf32, #tpu.memory_space<vmem>>) attributes {dimension_semantics = [#tpu.dimension_semantics<parallel>], iteration_bounds = array<i64: 2>, scalar_prefetch = 0 : i64, scratch_operands = 0 : i64, tpu.core_type = #tpu.core_type<tc>, window_params = [{transform_indices = @transform_0, window_bounds = array<i64: 1, 28, 28>}, {pipeline_mode = #tpu.pipeline_mode<synchronous>, transform_indices = @transform_1, window_bounds = array<i64: 5, 28, 144>}, {pipeline_mode = #tpu.pipeline_mode<synchronous>, transform_indices = @transform_2, window_bounds = array<i64: 1, 144>}, {pipeline_mode = #tpu.pipeline_mode<synchronous>, transform_indices = @transform_3, window_bounds = array<i64: 2, 144, 72>}, {pipeline_mode = #tpu.pipeline_mode<synchronous>, transform_indices = @transform_4, window_bounds = array<i64: 2, 12, 24>}, {pipeline_mode = #tpu.pipeline_mode<synchronous>, transform_indices = @transform_5, window_bounds = array<i64: 3, 72, 80>}, {pipeline_mode = #tpu.pipeline_mode<synchronous>, transform_indices = @transform_6, window_bounds = array<i64: 1, 80>}, {pipeline_mode = #tpu.pipeline_mode<synchronous>, transform_indices = @transform_7, window_bounds = array<i64: 2, 80, 40>}, {pipeline_mode = #tpu.pipeline_mode<synchronous>, transform_indices = @transform_8, window_bounds = array<i64: 2, 5, 10>}, {pipeline_mode = #tpu.pipeline_mode<synchronous>, transform_indices = @transform_9, window_bounds = array<i64: 5, 40, 32>}, {pipeline_mode = #tpu.pipeline_mode<synchronous>, transform_indices = @transform_10, window_bounds = array<i64: 1, 32>}, {pipeline_mode = #tpu.pipeline_mode<synchronous>, transform_indices = @transform_11, window_bounds = array<i64: 32, 10>}, {pipeline_mode = #tpu.pipeline_mode<synchronous>, transform_indices = @transform_12, window_bounds = array<i64: 1, 10>}, {transform_indices = @transform_13, window_bounds = array<i64: 1, 1, 10>}]} {
    %c0 = arith.constant 0 : index
    %c0_0 = arith.constant 0 : index
    %c0_1 = arith.constant 0 : index
    %0 = vector.load %arg1[%c0, %c0_0, %c0_1] : memref<1x28x28xf32, #tpu.memory_space<vmem>>, vector<1x24x28xf32>
    %1 = vector.shape_cast %0 : vector<1x24x28xf32> to vector<24x28xf32>
    %c0_2 = arith.constant 0 : index
    %c0_3 = arith.constant 0 : index
    %c0_4 = arith.constant 0 : index
    %2 = vector.load %arg2[%c0_2, %c0_3, %c0_4] : memref<5x28x144xf32, #tpu.memory_space<vmem>>, vector<1x28x144xf32>
    %3 = vector.shape_cast %2 : vector<1x28x144xf32> to vector<28x144xf32>
    %cst = arith.constant dense<0.000000e+00> : vector<24x144xf32>
    %4 = tpu.matmul %1, %3, %cst {dimension_numbers = #tpu.dot_dimension_numbers<[1], [0], [0], [1], [0, 0, 1, 1], [], []>} : vector<24x28xf32>, vector<28x144xf32>, vector<24x144xf32> -> vector<24x144xf32>
    %c0_5 = arith.constant 0 : index
    %c1 = arith.constant 1 : index
    %c0_6 = arith.constant 0 : index
    %5 = vector.load %arg1[%c0_5, %c1, %c0_6] : memref<1x28x28xf32, #tpu.memory_space<vmem>>, vector<1x24x28xf32>
    %6 = vector.shape_cast %5 : vector<1x24x28xf32> to vector<24x28xf32>
    %c1_7 = arith.constant 1 : index
    %c0_8 = arith.constant 0 : index
    %c0_9 = arith.constant 0 : index
    %7 = vector.load %arg2[%c1_7, %c0_8, %c0_9] : memref<5x28x144xf32, #tpu.memory_space<vmem>>, vector<1x28x144xf32>
    %8 = vector.shape_cast %7 : vector<1x28x144xf32> to vector<28x144xf32>
    %cst_10 = arith.constant dense<0.000000e+00> : vector<24x144xf32>
    %9 = tpu.matmul %6, %8, %cst_10 {dimension_numbers = #tpu.dot_dimension_numbers<[1], [0], [0], [1], [0, 0, 1, 1], [], []>} : vector<24x28xf32>, vector<28x144xf32>, vector<24x144xf32> -> vector<24x144xf32>
    %10 = arith.addf %4, %9 : vector<24x144xf32>
    %c0_11 = arith.constant 0 : index
    %c2 = arith.constant 2 : index
    %c0_12 = arith.constant 0 : index
    %11 = vector.load %arg1[%c0_11, %c2, %c0_12] : memref<1x28x28xf32, #tpu.memory_space<vmem>>, vector<1x24x28xf32>
    %12 = vector.shape_cast %11 : vector<1x24x28xf32> to vector<24x28xf32>
    %c2_13 = arith.constant 2 : index
    %c0_14 = arith.constant 0 : index
    %c0_15 = arith.constant 0 : index
    %13 = vector.load %arg2[%c2_13, %c0_14, %c0_15] : memref<5x28x144xf32, #tpu.memory_space<vmem>>, vector<1x28x144xf32>
    %14 = vector.shape_cast %13 : vector<1x28x144xf32> to vector<28x144xf32>
    %cst_16 = arith.constant dense<0.000000e+00> : vector<24x144xf32>
    %15 = tpu.matmul %12, %14, %cst_16 {dimension_numbers = #tpu.dot_dimension_numbers<[1], [0], [0], [1], [0, 0, 1, 1], [], []>} : vector<24x28xf32>, vector<28x144xf32>, vector<24x144xf32> -> vector<24x144xf32>
    %16 = arith.addf %10, %15 : vector<24x144xf32>
    %c0_17 = arith.constant 0 : index
    %c3 = arith.constant 3 : index
    %c0_18 = arith.constant 0 : index
    %17 = vector.load %arg1[%c0_17, %c3, %c0_18] : memref<1x28x28xf32, #tpu.memory_space<vmem>>, vector<1x24x28xf32>
    %18 = vector.shape_cast %17 : vector<1x24x28xf32> to vector<24x28xf32>
    %c3_19 = arith.constant 3 : index
    %c0_20 = arith.constant 0 : index
    %c0_21 = arith.constant 0 : index
    %19 = vector.load %arg2[%c3_19, %c0_20, %c0_21] : memref<5x28x144xf32, #tpu.memory_space<vmem>>, vector<1x28x144xf32>
    %20 = vector.shape_cast %19 : vector<1x28x144xf32> to vector<28x144xf32>
    %cst_22 = arith.constant dense<0.000000e+00> : vector<24x144xf32>
    %21 = tpu.matmul %18, %20, %cst_22 {dimension_numbers = #tpu.dot_dimension_numbers<[1], [0], [0], [1], [0, 0, 1, 1], [], []>} : vector<24x28xf32>, vector<28x144xf32>, vector<24x144xf32> -> vector<24x144xf32>
    %22 = arith.addf %16, %21 : vector<24x144xf32>
    %c0_23 = arith.constant 0 : index
    %c4 = arith.constant 4 : index
    %c0_24 = arith.constant 0 : index
    %23 = vector.load %arg1[%c0_23, %c4, %c0_24] : memref<1x28x28xf32, #tpu.memory_space<vmem>>, vector<1x24x28xf32>
    %24 = vector.shape_cast %23 : vector<1x24x28xf32> to vector<24x28xf32>
    %c4_25 = arith.constant 4 : index
    %c0_26 = arith.constant 0 : index
    %c0_27 = arith.constant 0 : index
    %25 = vector.load %arg2[%c4_25, %c0_26, %c0_27] : memref<5x28x144xf32, #tpu.memory_space<vmem>>, vector<1x28x144xf32>
    %26 = vector.shape_cast %25 : vector<1x28x144xf32> to vector<28x144xf32>
    %cst_28 = arith.constant dense<0.000000e+00> : vector<24x144xf32>
    %27 = tpu.matmul %24, %26, %cst_28 {dimension_numbers = #tpu.dot_dimension_numbers<[1], [0], [0], [1], [0, 0, 1, 1], [], []>} : vector<24x28xf32>, vector<28x144xf32>, vector<24x144xf32> -> vector<24x144xf32>
    %28 = arith.addf %22, %27 : vector<24x144xf32>
    %c0_29 = arith.constant 0 : index
    %c0_30 = arith.constant 0 : index
    %29 = vector.load %arg3[%c0_29, %c0_30] : memref<1x144xf32, #tpu.memory_space<vmem>>, vector<1x144xf32>
    %30 = vector.broadcast %29 : vector<1x144xf32> to vector<24x144xf32>
    %31 = arith.addf %28, %30 : vector<24x144xf32>
    %cst_31 = arith.constant 0.000000e+00 : f32
    %32 = vector.broadcast %cst_31 : f32 to vector<24x144xf32>
    %33 = arith.maximumf %31, %32 : vector<24x144xf32>
    %c0_32 = arith.constant 0 : index
    %c0_33 = arith.constant 0 : index
    %c0_34 = arith.constant 0 : index
    %34 = vector.load %arg4[%c0_32, %c0_33, %c0_34] : memref<2x144x72xf32, #tpu.memory_space<vmem>>, vector<1x144x72xf32>
    %35 = vector.shape_cast %34 : vector<1x144x72xf32> to vector<144x72xf32>
    %cst_35 = arith.constant dense<0.000000e+00> : vector<24x72xf32>
    %36 = tpu.matmul %33, %35, %cst_35 {dimension_numbers = #tpu.dot_dimension_numbers<[1], [0], [0], [1], [0, 0, 1, 1], [], []>} : vector<24x144xf32>, vector<144x72xf32>, vector<24x72xf32> -> vector<24x72xf32>
    %c1_36 = arith.constant 1 : index
    %c0_37 = arith.constant 0 : index
    %c0_38 = arith.constant 0 : index
    %37 = vector.load %arg4[%c1_36, %c0_37, %c0_38] : memref<2x144x72xf32, #tpu.memory_space<vmem>>, vector<1x144x72xf32>
    %38 = vector.shape_cast %37 : vector<1x144x72xf32> to vector<144x72xf32>
    %cst_39 = arith.constant dense<0.000000e+00> : vector<24x72xf32>
    %39 = tpu.matmul %33, %38, %cst_39 {dimension_numbers = #tpu.dot_dimension_numbers<[1], [0], [0], [1], [0, 0, 1, 1], [], []>} : vector<24x144xf32>, vector<144x72xf32>, vector<24x72xf32> -> vector<24x72xf32>
    %40 = arith.maximumf %36, %39 : vector<24x72xf32>
    %c0_40 = arith.constant 0 : index
    %c0_41 = arith.constant 0 : index
    %c0_42 = arith.constant 0 : index
    %41 = vector.load %arg5[%c0_40, %c0_41, %c0_42] : memref<2x12x24xf32, #tpu.memory_space<vmem>>, vector<1x12x24xf32>
    %42 = vector.shape_cast %41 : vector<1x12x24xf32> to vector<12x24xf32>
    %cst_43 = arith.constant dense<0.000000e+00> : vector<12x72xf32>
    %43 = tpu.matmul %42, %40, %cst_43 {dimension_numbers = #tpu.dot_dimension_numbers<[1], [0], [0], [1], [0, 0, 1, 1], [], []>} : vector<12x24xf32>, vector<24x72xf32>, vector<12x72xf32> -> vector<12x72xf32>
    %c1_44 = arith.constant 1 : index
    %c0_45 = arith.constant 0 : index
    %c0_46 = arith.constant 0 : index
    %44 = vector.load %arg5[%c1_44, %c0_45, %c0_46] : memref<2x12x24xf32, #tpu.memory_space<vmem>>, vector<1x12x24xf32>
    %45 = vector.shape_cast %44 : vector<1x12x24xf32> to vector<12x24xf32>
    %cst_47 = arith.constant dense<0.000000e+00> : vector<12x72xf32>
    %46 = tpu.matmul %45, %40, %cst_47 {dimension_numbers = #tpu.dot_dimension_numbers<[1], [0], [0], [1], [0, 0, 1, 1], [], []>} : vector<12x24xf32>, vector<24x72xf32>, vector<12x72xf32> -> vector<12x72xf32>
    %47 = arith.maximumf %43, %46 : vector<12x72xf32>
    %48 = vector.extract_strided_slice %47 {offsets = [0, 0], sizes = [10, 72], strides = [1, 1]} : vector<12x72xf32> to vector<10x72xf32>
    %c0_48 = arith.constant 0 : index
    %c0_49 = arith.constant 0 : index
    %c0_50 = arith.constant 0 : index
    %49 = vector.load %arg6[%c0_48, %c0_49, %c0_50] : memref<3x72x80xf32, #tpu.memory_space<vmem>>, vector<1x72x80xf32>
    %50 = vector.shape_cast %49 : vector<1x72x80xf32> to vector<72x80xf32>
    %cst_51 = arith.constant dense<0.000000e+00> : vector<10x80xf32>
    %51 = tpu.matmul %48, %50, %cst_51 {dimension_numbers = #tpu.dot_dimension_numbers<[1], [0], [0], [1], [0, 0, 1, 1], [], []>} : vector<10x72xf32>, vector<72x80xf32>, vector<10x80xf32> -> vector<10x80xf32>
    %52 = vector.extract_strided_slice %47 {offsets = [1, 0], sizes = [10, 72], strides = [1, 1]} : vector<12x72xf32> to vector<10x72xf32>
    %c1_52 = arith.constant 1 : index
    %c0_53 = arith.constant 0 : index
    %c0_54 = arith.constant 0 : index
    %53 = vector.load %arg6[%c1_52, %c0_53, %c0_54] : memref<3x72x80xf32, #tpu.memory_space<vmem>>, vector<1x72x80xf32>
    %54 = vector.shape_cast %53 : vector<1x72x80xf32> to vector<72x80xf32>
    %cst_55 = arith.constant dense<0.000000e+00> : vector<10x80xf32>
    %55 = tpu.matmul %52, %54, %cst_55 {dimension_numbers = #tpu.dot_dimension_numbers<[1], [0], [0], [1], [0, 0, 1, 1], [], []>} : vector<10x72xf32>, vector<72x80xf32>, vector<10x80xf32> -> vector<10x80xf32>
    %56 = arith.addf %51, %55 : vector<10x80xf32>
    %57 = vector.extract_strided_slice %47 {offsets = [2, 0], sizes = [10, 72], strides = [1, 1]} : vector<12x72xf32> to vector<10x72xf32>
    %c2_56 = arith.constant 2 : index
    %c0_57 = arith.constant 0 : index
    %c0_58 = arith.constant 0 : index
    %58 = vector.load %arg6[%c2_56, %c0_57, %c0_58] : memref<3x72x80xf32, #tpu.memory_space<vmem>>, vector<1x72x80xf32>
    %59 = vector.shape_cast %58 : vector<1x72x80xf32> to vector<72x80xf32>
    %cst_59 = arith.constant dense<0.000000e+00> : vector<10x80xf32>
    %60 = tpu.matmul %57, %59, %cst_59 {dimension_numbers = #tpu.dot_dimension_numbers<[1], [0], [0], [1], [0, 0, 1, 1], [], []>} : vector<10x72xf32>, vector<72x80xf32>, vector<10x80xf32> -> vector<10x80xf32>
    %61 = arith.addf %56, %60 : vector<10x80xf32>
    %c0_60 = arith.constant 0 : index
    %c0_61 = arith.constant 0 : index
    %62 = vector.load %arg7[%c0_60, %c0_61] : memref<1x80xf32, #tpu.memory_space<vmem>>, vector<1x80xf32>
    %63 = vector.broadcast %62 : vector<1x80xf32> to vector<10x80xf32>
    %64 = arith.addf %61, %63 : vector<10x80xf32>
    %cst_62 = arith.constant 0.000000e+00 : f32
    %65 = vector.broadcast %cst_62 : f32 to vector<10x80xf32>
    %66 = arith.maximumf %64, %65 : vector<10x80xf32>
    %c0_63 = arith.constant 0 : index
    %c0_64 = arith.constant 0 : index
    %c0_65 = arith.constant 0 : index
    %67 = vector.load %arg8[%c0_63, %c0_64, %c0_65] : memref<2x80x40xf32, #tpu.memory_space<vmem>>, vector<1x80x40xf32>
    %68 = vector.shape_cast %67 : vector<1x80x40xf32> to vector<80x40xf32>
    %cst_66 = arith.constant dense<0.000000e+00> : vector<10x40xf32>
    %69 = tpu.matmul %66, %68, %cst_66 {dimension_numbers = #tpu.dot_dimension_numbers<[1], [0], [0], [1], [0, 0, 1, 1], [], []>} : vector<10x80xf32>, vector<80x40xf32>, vector<10x40xf32> -> vector<10x40xf32>
    %c1_67 = arith.constant 1 : index
    %c0_68 = arith.constant 0 : index
    %c0_69 = arith.constant 0 : index
    %70 = vector.load %arg8[%c1_67, %c0_68, %c0_69] : memref<2x80x40xf32, #tpu.memory_space<vmem>>, vector<1x80x40xf32>
    %71 = vector.shape_cast %70 : vector<1x80x40xf32> to vector<80x40xf32>
    %cst_70 = arith.constant dense<0.000000e+00> : vector<10x40xf32>
    %72 = tpu.matmul %66, %71, %cst_70 {dimension_numbers = #tpu.dot_dimension_numbers<[1], [0], [0], [1], [0, 0, 1, 1], [], []>} : vector<10x80xf32>, vector<80x40xf32>, vector<10x40xf32> -> vector<10x40xf32>
    %73 = arith.maximumf %69, %72 : vector<10x40xf32>
    %c0_71 = arith.constant 0 : index
    %c0_72 = arith.constant 0 : index
    %c0_73 = arith.constant 0 : index
    %74 = vector.load %arg9[%c0_71, %c0_72, %c0_73] : memref<2x5x10xf32, #tpu.memory_space<vmem>>, vector<1x5x10xf32>
    %75 = vector.shape_cast %74 : vector<1x5x10xf32> to vector<5x10xf32>
    %cst_74 = arith.constant dense<0.000000e+00> : vector<5x40xf32>
    %76 = tpu.matmul %75, %73, %cst_74 {dimension_numbers = #tpu.dot_dimension_numbers<[1], [0], [0], [1], [0, 0, 1, 1], [], []>} : vector<5x10xf32>, vector<10x40xf32>, vector<5x40xf32> -> vector<5x40xf32>
    %c1_75 = arith.constant 1 : index
    %c0_76 = arith.constant 0 : index
    %c0_77 = arith.constant 0 : index
    %77 = vector.load %arg9[%c1_75, %c0_76, %c0_77] : memref<2x5x10xf32, #tpu.memory_space<vmem>>, vector<1x5x10xf32>
    %78 = vector.shape_cast %77 : vector<1x5x10xf32> to vector<5x10xf32>
    %cst_78 = arith.constant dense<0.000000e+00> : vector<5x40xf32>
    %79 = tpu.matmul %78, %73, %cst_78 {dimension_numbers = #tpu.dot_dimension_numbers<[1], [0], [0], [1], [0, 0, 1, 1], [], []>} : vector<5x10xf32>, vector<10x40xf32>, vector<5x40xf32> -> vector<5x40xf32>
    %80 = arith.maximumf %76, %79 : vector<5x40xf32>
    %c0_79 = arith.constant 0 : index
    %c0_80 = arith.constant 0 : index
    %81 = vector.load %arg11[%c0_79, %c0_80] : memref<1x32xf32, #tpu.memory_space<vmem>>, vector<1x32xf32>
    %82 = vector.extract_strided_slice %80 {offsets = [0, 0], sizes = [1, 40], strides = [1, 1]} : vector<5x40xf32> to vector<1x40xf32>
    %c0_81 = arith.constant 0 : index
    %c0_82 = arith.constant 0 : index
    %c0_83 = arith.constant 0 : index
    %83 = vector.load %arg10[%c0_81, %c0_82, %c0_83] : memref<5x40x32xf32, #tpu.memory_space<vmem>>, vector<1x40x32xf32>
    %84 = vector.shape_cast %83 : vector<1x40x32xf32> to vector<40x32xf32>
    %cst_84 = arith.constant dense<0.000000e+00> : vector<1x32xf32>
    %85 = tpu.matmul %82, %84, %cst_84 {dimension_numbers = #tpu.dot_dimension_numbers<[1], [0], [0], [1], [0, 0, 1, 1], [], []>} : vector<1x40xf32>, vector<40x32xf32>, vector<1x32xf32> -> vector<1x32xf32>
    %86 = arith.addf %81, %85 : vector<1x32xf32>
    %87 = vector.extract_strided_slice %80 {offsets = [1, 0], sizes = [1, 40], strides = [1, 1]} : vector<5x40xf32> to vector<1x40xf32>
    %c1_85 = arith.constant 1 : index
    %c0_86 = arith.constant 0 : index
    %c0_87 = arith.constant 0 : index
    %88 = vector.load %arg10[%c1_85, %c0_86, %c0_87] : memref<5x40x32xf32, #tpu.memory_space<vmem>>, vector<1x40x32xf32>
    %89 = vector.shape_cast %88 : vector<1x40x32xf32> to vector<40x32xf32>
    %cst_88 = arith.constant dense<0.000000e+00> : vector<1x32xf32>
    %90 = tpu.matmul %87, %89, %cst_88 {dimension_numbers = #tpu.dot_dimension_numbers<[1], [0], [0], [1], [0, 0, 1, 1], [], []>} : vector<1x40xf32>, vector<40x32xf32>, vector<1x32xf32> -> vector<1x32xf32>
    %91 = arith.addf %86, %90 : vector<1x32xf32>
    %92 = vector.extract_strided_slice %80 {offsets = [2, 0], sizes = [1, 40], strides = [1, 1]} : vector<5x40xf32> to vector<1x40xf32>
    %c2_89 = arith.constant 2 : index
    %c0_90 = arith.constant 0 : index
    %c0_91 = arith.constant 0 : index
    %93 = vector.load %arg10[%c2_89, %c0_90, %c0_91] : memref<5x40x32xf32, #tpu.memory_space<vmem>>, vector<1x40x32xf32>
    %94 = vector.shape_cast %93 : vector<1x40x32xf32> to vector<40x32xf32>
    %cst_92 = arith.constant dense<0.000000e+00> : vector<1x32xf32>
    %95 = tpu.matmul %92, %94, %cst_92 {dimension_numbers = #tpu.dot_dimension_numbers<[1], [0], [0], [1], [0, 0, 1, 1], [], []>} : vector<1x40xf32>, vector<40x32xf32>, vector<1x32xf32> -> vector<1x32xf32>
    %96 = arith.addf %91, %95 : vector<1x32xf32>
    %97 = vector.extract_strided_slice %80 {offsets = [3, 0], sizes = [1, 40], strides = [1, 1]} : vector<5x40xf32> to vector<1x40xf32>
    %c3_93 = arith.constant 3 : index
    %c0_94 = arith.constant 0 : index
    %c0_95 = arith.constant 0 : index
    %98 = vector.load %arg10[%c3_93, %c0_94, %c0_95] : memref<5x40x32xf32, #tpu.memory_space<vmem>>, vector<1x40x32xf32>
    %99 = vector.shape_cast %98 : vector<1x40x32xf32> to vector<40x32xf32>
    %cst_96 = arith.constant dense<0.000000e+00> : vector<1x32xf32>
    %100 = tpu.matmul %97, %99, %cst_96 {dimension_numbers = #tpu.dot_dimension_numbers<[1], [0], [0], [1], [0, 0, 1, 1], [], []>} : vector<1x40xf32>, vector<40x32xf32>, vector<1x32xf32> -> vector<1x32xf32>
    %101 = arith.addf %96, %100 : vector<1x32xf32>
    %102 = vector.extract_strided_slice %80 {offsets = [4, 0], sizes = [1, 40], strides = [1, 1]} : vector<5x40xf32> to vector<1x40xf32>
    %c4_97 = arith.constant 4 : index
    %c0_98 = arith.constant 0 : index
    %c0_99 = arith.constant 0 : index
    %103 = vector.load %arg10[%c4_97, %c0_98, %c0_99] : memref<5x40x32xf32, #tpu.memory_space<vmem>>, vector<1x40x32xf32>
    %104 = vector.shape_cast %103 : vector<1x40x32xf32> to vector<40x32xf32>
    %cst_100 = arith.constant dense<0.000000e+00> : vector<1x32xf32>
    %105 = tpu.matmul %102, %104, %cst_100 {dimension_numbers = #tpu.dot_dimension_numbers<[1], [0], [0], [1], [0, 0, 1, 1], [], []>} : vector<1x40xf32>, vector<40x32xf32>, vector<1x32xf32> -> vector<1x32xf32>
    %106 = arith.addf %101, %105 : vector<1x32xf32>
    %cst_101 = arith.constant 0.000000e+00 : f32
    %107 = vector.broadcast %cst_101 : f32 to vector<1x32xf32>
    %108 = arith.maximumf %106, %107 : vector<1x32xf32>
    %c0_102 = arith.constant 0 : index
    %c0_103 = arith.constant 0 : index
    %109 = vector.load %arg12[%c0_102, %c0_103] : memref<32x10xf32, #tpu.memory_space<vmem>>, vector<32x10xf32>
    %cst_104 = arith.constant dense<0.000000e+00> : vector<1x10xf32>
    %110 = tpu.matmul %108, %109, %cst_104 {dimension_numbers = #tpu.dot_dimension_numbers<[1], [0], [0], [1], [0, 0, 1, 1], [], []>} : vector<1x32xf32>, vector<32x10xf32>, vector<1x10xf32> -> vector<1x10xf32>
    %c0_105 = arith.constant 0 : index
    %c0_106 = arith.constant 0 : index
    %111 = vector.load %arg13[%c0_105, %c0_106] : memref<1x10xf32, #tpu.memory_space<vmem>>, vector<1x10xf32>
    %112 = arith.addf %110, %111 : vector<1x10xf32>
    %cst_107 = arith.constant dense<0xFF800000> : vector<1xf32>
    %113 = vector.multi_reduction <maximumf>, %112, %cst_107 [1] : vector<1x10xf32> to vector<1xf32>
    %114 = vector.shape_cast %113 : vector<1xf32> to vector<1x1xf32>
    %115 = vector.broadcast %114 : vector<1x1xf32> to vector<1x10xf32>
    %116 = arith.subf %112, %115 : vector<1x10xf32>
    %117 = math.exp %116 : vector<1x10xf32>
    %cst_108 = arith.constant dense<0.000000e+00> : vector<1xf32>
    %118 = vector.multi_reduction <add>, %117, %cst_108 [1] : vector<1x10xf32> to vector<1xf32>
    %119 = vector.shape_cast %118 : vector<1xf32> to vector<1x1xf32>
    %120 = tpu.reciprocal %119 {approx = true} : vector<1x1xf32> -> vector<1x1xf32>
    %121 = arith.mulf %119, %120 : vector<1x1xf32>
    %cst_109 = arith.constant 2.000000e+00 : f32
    %122 = vector.broadcast %cst_109 : f32 to vector<1x1xf32>
    %123 = arith.subf %122, %121 : vector<1x1xf32>
    %124 = arith.mulf %120, %123 : vector<1x1xf32>
    %125 = vector.broadcast %124 : vector<1x1xf32> to vector<1x10xf32>
    %126 = arith.mulf %117, %125 : vector<1x10xf32>
    %c0_110 = arith.constant 0 : index
    %c0_111 = arith.constant 0 : index
    %c0_112 = arith.constant 0 : index
    %127 = vector.load %arg14[%c0_110, %c0_111, %c0_112] : memref<1x1x10xf32, #tpu.memory_space<vmem>>, vector<1x1x10xf32>
    %128 = vector.shape_cast %127 : vector<1x1x10xf32> to vector<1x10xf32>
    %129 = vector.shape_cast %126 : vector<1x10xf32> to vector<1x1x10xf32>
    tpu.vector_store %arg14[%c0_110, %c0_111, %c0_112], %129 {strides = array<i32>} : memref<1x1x10xf32, #tpu.memory_space<vmem>>, vector<1x1x10xf32>,
    return
  }
  func.func @transform_0(%arg0: i32) -> (i32, i32, i32) {
    %c0_i32 = arith.constant 0 : i32
    %c0_i32_0 = arith.constant 0 : i32
    %c0_i32_1 = arith.constant 0 : i32
    return %arg0, %c0_i32, %c0_i32_0 : i32, i32, i32
  }
  func.func @transform_1(%arg0: i32) -> (i32, i32, i32) {
    %c0_i32 = arith.constant 0 : i32
    %c0_i32_0 = arith.constant 0 : i32
    %c0_i32_1 = arith.constant 0 : i32
    %c0_i32_2 = arith.constant 0 : i32
    return %c0_i32, %c0_i32_0, %c0_i32_1 : i32, i32, i32
  }
  func.func @transform_2(%arg0: i32) -> (i32, i32) {
    %c0_i32 = arith.constant 0 : i32
    %c0_i32_0 = arith.constant 0 : i32
    %c0_i32_1 = arith.constant 0 : i32
    return %c0_i32, %c0_i32_0 : i32, i32
  }
  func.func @transform_3(%arg0: i32) -> (i32, i32, i32) {
    %c0_i32 = arith.constant 0 : i32
    %c0_i32_0 = arith.constant 0 : i32
    %c0_i32_1 = arith.constant 0 : i32
    %c0_i32_2 = arith.constant 0 : i32
    return %c0_i32, %c0_i32_0, %c0_i32_1 : i32, i32, i32
  }
  func.func @transform_4(%arg0: i32) -> (i32, i32, i32) {
    %c0_i32 = arith.constant 0 : i32
    %c0_i32_0 = arith.constant 0 : i32
    %c0_i32_1 = arith.constant 0 : i32
    %c0_i32_2 = arith.constant 0 : i32
    return %c0_i32, %c0_i32_0, %c0_i32_1 : i32, i32, i32
  }
  func.func @transform_5(%arg0: i32) -> (i32, i32, i32) {
    %c0_i32 = arith.constant 0 : i32
    %c0_i32_0 = arith.constant 0 : i32
    %c0_i32_1 = arith.constant 0 : i32
    %c0_i32_2 = arith.constant 0 : i32
    return %c0_i32, %c0_i32_0, %c0_i32_1 : i32, i32, i32
  }
  func.func @transform_6(%arg0: i32) -> (i32, i32) {
    %c0_i32 = arith.constant 0 : i32
    %c0_i32_0 = arith.constant 0 : i32
    %c0_i32_1 = arith.constant 0 : i32
    return %c0_i32, %c0_i32_0 : i32, i32
  }
  func.func @transform_7(%arg0: i32) -> (i32, i32, i32) {
    %c0_i32 = arith.constant 0 : i32
    %c0_i32_0 = arith.constant 0 : i32
    %c0_i32_1 = arith.constant 0 : i32
    %c0_i32_2 = arith.constant 0 : i32
    return %c0_i32, %c0_i32_0, %c0_i32_1 : i32, i32, i32
  }
  func.func @transform_8(%arg0: i32) -> (i32, i32, i32) {
    %c0_i32 = arith.constant 0 : i32
    %c0_i32_0 = arith.constant 0 : i32
    %c0_i32_1 = arith.constant 0 : i32
    %c0_i32_2 = arith.constant 0 : i32
    return %c0_i32, %c0_i32_0, %c0_i32_1 : i32, i32, i32
  }
  func.func @transform_9(%arg0: i32) -> (i32, i32, i32) {
    %c0_i32 = arith.constant 0 : i32
    %c0_i32_0 = arith.constant 0 : i32
    %c0_i32_1 = arith.constant 0 : i32
    %c0_i32_2 = arith.constant 0 : i32
    return %c0_i32, %c0_i32_0, %c0_i32_1 : i32, i32, i32
  }
  func.func @transform_10(%arg0: i32) -> (i32, i32) {
    %c0_i32 = arith.constant 0 : i32
    %c0_i32_0 = arith.constant 0 : i32
    %c0_i32_1 = arith.constant 0 : i32
    return %c0_i32, %c0_i32_0 : i32, i32
  }
  func.func @transform_11(%arg0: i32) -> (i32, i32) {
    %c0_i32 = arith.constant 0 : i32
    %c0_i32_0 = arith.constant 0 : i32
    %c0_i32_1 = arith.constant 0 : i32
    return %c0_i32, %c0_i32_0 : i32, i32
  }
  func.func @transform_12(%arg0: i32) -> (i32, i32) {
    %c0_i32 = arith.constant 0 : i32
    %c0_i32_0 = arith.constant 0 : i32
    %c0_i32_1 = arith.constant 0 : i32
    return %c0_i32, %c0_i32_0 : i32, i32
  }
  func.func @transform_13(%arg0: i32) -> (i32, i32, i32) {
    %c0_i32 = arith.constant 0 : i32
    %c0_i32_0 = arith.constant 0 : i32
    %c0_i32_1 = arith.constant 0 : i32
    return %arg0, %c0_i32, %c0_i32_0 : i32, i32, i32
  }
}

</mosaic_0001>

<bundles_post_ra>
// kernel: tpu_custom_call.1
= control target key start
LH: loop header
LB: loop body
LE: loop exit
PB: predicated region body
PF: predicated region fallthrough
CT: control target
= control target key end

     0   :  { %s4418_s0 = inlined_call_operand.vmem [shape: f32[2,28,28], index: 0, kind: input, shape index: {}]   ;;  %s4419_s1 = inlined_call_operand.vmem [shape: f32[5,28,144], index: 1, kind: input, shape index: {}]   ;;  %s4420_s2 = inlined_call_operand.hbm [shape: f32[1,144], index: 2, kind: input, shape index: {}]   ;;  %s4421_s3 = inlined_call_operand.vmem [shape: f32[2,144,72], index: 3, kind: input, shape index: {}]   ;;  %s4422_s4 = inlined_call_operand.vmem [shape: f32[2,12,24], index: 4, kind: input, shape index: {}]   ;;  %s4423_s5 = inlined_call_operand.vmem [shape: f32[3,72,80], index: 5, kind: input, shape index: {}]   ;;  %s4424_s6 = inlined_call_operand.vmem [shape: f32[1,80], index: 6, kind: input, shape index: {}]   ;;  %s4425_s7 = inlined_call_operand.vmem [shape: f32[2,80,40], index: 7, kind: input, shape index: {}]   ;;  %s4426_s8 = inlined_call_operand.vmem [shape: f32[2,5,10], index: 8, kind: input, shape index: {}]   ;;  %s4427_s9 = inlined_call_operand.vmem [shape: f32[5,40,32], index: 9, kind: input, shape index: {}]   ;;  %s4428_s10 = inlined_call_operand.vmem [shape: f32[1,32], index: 10, kind: input, shape index: {}]   ;;  %s4429_s11 = inlined_call_operand.vmem [shape: f32[32,10], index: 11, kind: input, shape index: {}]   ;;  %s4430_s12 = inlined_call_operand.vmem [shape: f32[1,10], index: 12, kind: input, shape index: {}]   ;;  %s4431_s13 = inlined_call_operand.hbm [shape: f32[2,1,10], index: 13, kind: output, shape index: {}]  }
   0x1   :  { %4438 = sst [smem:[#allocation11_spill]] %s4418_s0 }
   0x2   :  { %4439 = sst [smem:[#allocation12_spill]] %s4420_s2 }
   0x3   :  { %18 = vsyncpa [#allocation3], 0 }
   0x4   :  { %19 = vsyncpa [#allocation4], 0 }
   0x5   :  { %21 = vsyncpa [#allocation4 + $0x1], 0  ;;  %s3631_s25 = smov 0   ;;  %s3633_s26 = smov 0  }
   0x6   :  { %s3635_s27 = smov 0   ;;  %s3637_s28 = smov 0  }
   0x7 LB: > { %4440 = sst [smem:[#allocation8_spill]] %s3549_s27  ;;  %s3652_s29 = sadd.s32 4294967295, %s3553_s28   ;;  %s3553_s28 = sphi %s3637_s28, %s4456_s28   ;;  %s3549_s27 = sphi %s3635_s27, %s4458_s27   ;;  %s3545_s26 = sphi %s3633_s26, %s4460_s26   ;;  %s3541_s25 = sphi %s3631_s25, %s4459_s25  }
   0x8   : > { %s2626_s30 = sadd.s32 4294967294, %s3553_s28   ;;  %s3656_s14 = sadd.s32 1, %s3553_s28  }
   0x9   : > { %4441 = sst [smem:[#allocation9_spill]] %s3656_s14  ;;  %s312_s15 = sadd.s32 1, %s3549_s27 }
   0xa   : > { %s309_s16 = ssub.s32 %s3553_s28, %s3656_s14  ;;  %p322_p0 = scmp.ne.s32.totalorder %s3549_s27, %s3545_s26 }
   0xb   : > { %p310_p1 = scmp.eq.s32.totalorder %s309_s16, 0  ;;  %p323_p2 = scmp.eq.s32.totalorder %s3652_s29, 1 }
   0xc   : > { %p328_p3 = scmp.ne.s32.totalorder %s3545_s26, %s3541_s25  ;;  %p329_p4 = scmp.eq.s32.totalorder %s2626_s30, 1 }
   0xd   : > { %s3667_s17 = scalar_select %p310_p1, %s3549_s27, %s312_s15  }
   0xe   : > { %p3669_p5 = por %p323_p2, %p322_p0  ;;  %p3673_p6 = por %p329_p4, %p328_p3 }
   0xf   : > { %4442 = sst [smem:[#allocation10_spill]] %s3667_s17  ;;  %p2627_p7 = scmp.ge.s32.totalorder %s3553_s28, 1 }
  0x10   : > { %s4443_s18 = scalar_select %p3669_p5, 1, 0 }
  0x11   : > { %s4444_s19 = scalar_select %p3673_p6, 1, 0 }
  0x12   : > { %p336_p8 = scmp.lt.s32.totalorder %s3553_s28, 3  ;;  %p4435_p9 = scmp.eq.s32.totalorder %s3652_s29, 0 }
  0x13   : > { %s3555_s21 = smov [#allocation2]   ;;  %s4447_s2 = sld [smem:[#allocation12_spill]] }
  0x14   : > { %p3680_p10 = pnand %p2627_p7, %p336_p8  ;;  %s352_s22 = sshll.u32 %s3555_s21, 4  ;;  %s353_s22 = int_to_ptr.vmem [resolvable:$true] %s352_s22 }
  0x16   : > { %s4445_s20 = scalar_select %p3680_p10, 1, 0 }
  0x17   : > { %p3407_p11 = pneg %p3680_p10 }
  0x19   : > { %p3688_p12 = pnand %p4435_p9, %p3407_p11  ;;  %s3459_s15 = scalar_lea.hbm %s4447_s2, 32 }
  0x1a   : > { %p3460_p13 = scmp.ne.s32.totalorder %s4447_s2, %s3459_s15  ;;  %p3466_p3 = scmp.lt.u32.totalorder %s3459_s15, %s4447_s2 }
  0x1b   : > { %p3461_p0 = pneg %p3688_p12 }
  0x1d   : > { %p3462_p1 = pnand %p3461_p0, %p3460_p13 }
  0x1f   : > { %p3463_p2 = pneg %p3462_p1 }
  0x21   : > { %p3468_p4 = pnand %p3466_p3, %p3463_p2 }
  0x23   : > { %3471 = shalt.err (!%p3468_p4)
}
  0x24   : > { %s3472_s14 = scalar_lea.vmem %s353_s22, 32  ;;  %p3480_p9 = scmp.lt.s32.totalorder %s353_s22, %s353_s22 }
  0x25   : > { %p3473_p7 = scmp.ne.s32.totalorder %s353_s22, %s3472_s14  ;;  %p3481_p6 = scmp.lt.s32.totalorder %s3472_s14, %s3472_s14 }
  0x27   : > { %p3475_p8 = pnand %p3473_p7, %p3461_p0  ;;  %p3482_p5 = por %p3481_p6, %p3480_p9 }
  0x29   : > { %p3476_p11 = pneg %p3475_p8 }
  0x2b   : > { %p3483_p10 = pnand %p3482_p5, %p3476_p11 }
  0x2d   : > { %3486 = shalt.err (!%p3483_p10)
}
  0x2e   : > { %3410 = dma.hbm_to_vmem [thread:$0]  (!%p3688_p12), %s4447_s2, 32, %s353_s22, [#allocation3]  }
  0x2f   : > { %p4448_p13 = scmp.ne.s32.totalorder %s4445_s20, 0 }
  0x30   : > { %p4449_p1 = scmp.eq.s32.totalorder (!%p4448_p13), %s3652_s29, 0 }
  0x31   : > { %403 = sbr.rel (%p4448_p13) target bundleno = 2317 (0x90d), region = 72 }
  0x38   : > { %3532 = dma.done.wait (%p4449_p1), [#allocation3], 32   ;;  %p4450_p0 = pmov %p4449_p1 }
  0x39   : > { %v3556_v0 = vmov 0.0   ;;  %p446_p5 = scmp.lt.s32.totalorder %s3652_s29, 1  ;;  %v3557_v1 = vmov 0.0|0.0   ;;  %vm484_vm0 = vcmask 1043456   ;;  %v2635_v2 = vld [vmem:[%s4419_s1 + $0x48] sm:$0xff]  ;;  %v2637_v3 = vld [vmem:[%s4419_s1 + $0x58] sm:$0xff] }
  0x3a   : > { %3534 = vsyncadd (%p4450_p0), [#allocation3], 4294967264  ;;  %555 = vmatprep.mubr.f32.mxu0 %v3556_v0  ;;  %3170 = vmatprep.subr.bf16.mxu1 %v3557_v1  ;;  %v2634_v4 = vld [vmem:[%s4419_s1 + $0x40] sm:$0xff]  ;;  %v3120_v5 = vpack.c.bf16 %v2637_v3, %v2635_v2  ;;  %v2636_v6 = vld [vmem:[%s4419_s1 + $0x50] sm:$0xff]  ;;  %vm3558_vm1 = vmmov 1   ;;  %s4453_s0 = sld [smem:[#allocation11_spill]] }
  0x3b   : > { %s447_s27 = scalar_select %p446_p5, %s3652_s29, 1  ;;  %v2639_v7 = vld [vmem:[%s4419_s1 + $0x68] sm:$0xff]  ;;  %v2641_v8 = vld [vmem:[%s4419_s1 + $0x78] sm:$0xf]  ;;  %v3122_v9 = vpack.c.bf16 %v2636_v6, %v2634_v4  ;;  %vm3737_vm2 = vmpackc.low %vm484_vm0, %vm3558_vm1  ;;  %vm474_vm3 = vcmask 228352   ;;  %vm1062_vm4 = vcmask 130048  }
  0x3c   : > { %v3124_v10 = vpack.c.bf16 %v2641_v8, %v2639_v7  ;;  %v2638_v12 = vld [vmem:[%s4419_s1 + $0x60] sm:$0xff]  ;;  %v2640_v13 = vld [vmem:[%s4419_s1 + $0x70] sm:$0xf]  ;;  %3121 = vmatprep.subr.bf16.mxu0 %v3120_v5  ;;  %v455_v14 = vld [vmem:[%s4419_s1 + $0x8] sm:$0xff]  ;;  %vm1256_vm5 = vcmask 195584   ;;  %vm1445_vm6 = vcmask 1046528  }
  0x3d   : > { %s2794_s15 = sshll.u32 %s447_s27, 5  ;;  %v457_v15 = vld [vmem:[%s4419_s1 + $0x18] sm:$0xff]  ;;  %3123 = vmatpush1.bf16.msra.mxu0 %v3122_v9  ;;  %v3127_v16 = vpack.c.bf16 %v2640_v13, %v2638_v12  ;;  %v454_v18 = vld [vmem:[%s4419_s1] sm:$0xff]  ;;  %v456_v19 = vld [vmem:[%s4419_s1 + $0x10] sm:$0xff]  ;;  %vm1618_vm7 = vcmask 1045504   ;;  %vm1449_vm8 = vcmask 588800  }
  0x3e   : > { %3126 = vmatprep.subr.msk.bf16.mxu0 %vm3737_vm2, %v3124_v10  ;;  %v3130_v17 = vpack.c.bf16 %v457_v15, %v455_v14  ;;  %v459_v20 = vld [vmem:[%s4419_s1 + $0x28] sm:$0xff]  ;;  %v461_v21 = vld [vmem:[%s4419_s1 + $0x38] sm:$0xf]  ;;  %v3132_v23 = vpack.c.bf16 %v456_v19, %v454_v18  ;;  %v458_v25 = vld [vmem:[%s4419_s1 + $0x20] sm:$0xff]  ;;  %vm1724_vm9 = vcmask 654336   ;;  %vm3559_vm10 = vmmov 0  }
  0x3f   : > { %v3134_v24 = vpack.c.bf16 %v461_v21, %v459_v20  ;;  %v460_v26 = vld [vmem:[%s4419_s1 + $0x30] sm:$0xf]  ;;  %v2653_v27 = vld [vmem:[%s4419_s1 + $0x88] sm:$0xff]  ;;  %v2655_v28 = vld [vmem:[%s4419_s1 + $0x98] sm:$0xff]  ;;  %vm1899_vm11 = vcmask 1041408   ;;  %vm1895_vm13 = vcmask 80896  }
  0x40   : > { %s3758_s20 = scalar_lea.vmem %s4453_s0, %s2794_s15  ;;  %v3137_v30 = vpack.c.bf16 %v460_v26, %v458_v25  ;;  %v3140_v31 = vpack.c.bf16 %v2655_v28, %v2653_v27  ;;  %v2652_v33 = vld [vmem:[%s4419_s1 + $0x80] sm:$0xff]  ;;  %v2654_v34 = vld [vmem:[%s4419_s1 + $0x90] sm:$0xff]  ;;  %v2657_v35 = vld [vmem:[%s4419_s1 + $0xa8] sm:$0xff]  ;;  %vm2055_vm14 = vcmask 326656   ;;  %vm2456_vm15 = vcmask 261120   ;;  %s444_s14 = sand.u32 1, %s3545_s26  }
  0x41   : > { %3129 = vmatpush1.bf16.msk.msra.mxu0 %vm3737_vm2, %v3127_v16  ;;  %v462_v22 = vld [vmem:[%s3758_s20 + $0x1] sm:$0xff]  ;;  %v463_v29 = vld [vmem:[%s3758_s20 + $0x9] sm:$0xff]  ;;  %v464_v32 = vld [vmem:[%s3758_s20 + $0x11] sm:$0xff]  ;;  %v3142_v43 = vpack.c.bf16 %v2654_v34, %v2652_v33  ;;  %vm2530_vm0 = vcmask 73728   ;;  %s2791_s27 = sshll.u32 %s3652_s29, 4  ;;  %s2547_s16 = scalar_lea.sflag [#allocation4], %s444_s14 }
  0x42   : > { %3131 = vmatprep.subr.bf16.mxu0 %v3130_v17  ;;  %v2659_v36 = vld [vmem:[%s4419_s1 + $0xb8] sm:$0xf]  ;;  %v1044_v37 = vld [vmem:[%s4421_s3] sm:$0xff]  ;;  %v1045_v38 = vld [vmem:[%s4421_s3 + $0x8] sm:$0xff]  ;;  %s4375_s2 = scalar_lea.hbm %s4431_s13, %s2791_s27  ;;  %p4454_p9 = scmp.ne.s32.totalorder %s4443_s18, 0 }
  0x43   : > { %v3171_v39 = vpack.c.bf16 %v1045_v38, %v1044_v37  ;;  %v1046_v40 = vld [vmem:[%s4421_s3 + $0x10] sm:$0xff]  ;;  %v1047_v41 = vld [vmem:[%s4421_s3 + $0x18] sm:$0xff]  ;;  %v451_v42 = vld [vmem:[%s3758_s20] sm:$0xff]  ;;  %v3144_v44 = vpack.c.bf16 %v2659_v36, %v2657_v35  ;;  %s3560_s29 = smov [#allocation5]  }
  0x44   : > { %2644 = vmatmul.mubr.msk.f32.vlgmr.msra.gmra.mrb[0].mxu0 %vm474_vm3, %v462_v22  ;;  %v2656_v45 = vld [vmem:[%s4419_s1 + $0xa0] sm:$0xff]  ;;  %v2658_v46 = vld [vmem:[%s4419_s1 + $0xb0] sm:$0xf]  ;;  %v2666_v47 = vld [vmem:[%s4419_s1 + $0xc8] sm:$0xff]  ;;  %v3174_v48 = vpack.c.bf16 %v1047_v41, %v1046_v40  ;;  %s3491_s17 = sshll.u32 %s3560_s29, 4  ;;  %s3492_s17 = int_to_ptr.vmem [resolvable:$false] %s3491_s17 }
  0x45   : > { %561 = vmatprep.mubr.f32.mxu0 %v3556_v0  ;;  %3133 = vmatpush1.bf16.msra.mxu0 %v3132_v23  ;;  %v2668_v49 = vld [vmem:[%s4419_s1 + $0xd8] sm:$0xff]  ;;  %v1048_v50 = vld [vmem:[%s4421_s3 + $0x20] sm:$0xff]  ;;  %v1049_v51 = vld [vmem:[%s4421_s3 + $0x28] sm:$0xff]  ;;  %v3147_v53 = vpack.c.bf16 %v2658_v46, %v2656_v45  ;;  %s3493_s15 = scalar_lea.vmem %s3492_s17, 32 }
  0x46   : > { %3136 = vmatprep.subr.msk.bf16.mxu0 %vm3737_vm2, %v3134_v24  ;;  %3172 = vmatpush1.bf16.msra.mxu1 %v3171_v39  ;;  %v452_v52 = vld [vmem:[%s3758_s20 + $0x8] sm:$0xff]  ;;  %v3150_v54 = vpack.c.bf16 %v2668_v49, %v2666_v47  ;;  %v3177_v55 = vpack.c.bf16 %v1049_v51, %v1048_v50  ;;  %v1050_v56 = vld [vmem:[%s4421_s3 + $0x30] sm:$0xff]  ;;  %v1051_v57 = vld [vmem:[%s4421_s3 + $0x38] sm:$0xff] }
  0x47   : > { %3173 = vmatprep.subr.bf16.mxu1 %v3557_v1  ;;  %v453_v58 = vld [vmem:[%s3758_s20 + $0x10] sm:$0xff]  ;;  %v2665_v59 = vld [vmem:[%s4419_s1 + $0xc0] sm:$0xff]  ;;  %v2670_v61 = vld [vmem:[%s4419_s1 + $0xe8] sm:$0xff]  ;;  %v3180_v62 = vpack.c.bf16 %v1051_v57, %v1050_v56 }
  0x48   : > { %2645 = vmatmul.mubr.msk.f32.gmra.mrb[2].mxu0 %vm474_vm3, %v463_v29  ;;  %v2667_v60 = vld [vmem:[%s4419_s1 + $0xd0] sm:$0xff]  ;;  %v2672_v63 = vld [vmem:[%s4419_s1 + $0xf8] sm:$0xf]  ;;  %v1052_v2 = vld [vmem:[%s4421_s3 + $0x40] sm:$0xff] }
  0x49   : > { %567 = vmatprep.mubr.f32.mxu0 %v3556_v0  ;;  %3139 = vmatpush1.bf16.msk.msra.mxu0 %vm3737_vm2, %v3137_v30  ;;  %v1053_v3 = vld [vmem:[%s4421_s3 + $0x48] sm:$0xff]  ;;  %v3152_v5 = vpack.c.bf16 %v2667_v60, %v2665_v59  ;;  %v3154_v6 = vpack.c.bf16 %v2672_v63, %v2670_v61  ;;  %v2669_v7 = vld [vmem:[%s4419_s1 + $0xe0] sm:$0xff]  ;;  %v2671_v8 = vld [vmem:[%s4419_s1 + $0xf0] sm:$0xf] }
  0x4a   : > { %3141 = vmatprep.subr.bf16.mxu0 %v3140_v31  ;;  %3175 = vmatpush1.bf16.msra.mxu1 %v3174_v48  ;;  %v672_v4 = vld [vmem:[%s3758_s20 + $0x2] sm:$0xff]  ;;  %v3183_v10 = vpack.c.bf16 %v1053_v3, %v1052_v2  ;;  %v2681_v12 = vld [vmem:[%s4419_s1 + $0x118] sm:$0xff]  ;;  %v1054_v13 = vld [vmem:[%s4421_s3 + $0x50] sm:$0xff]  ;;  %v3157_v16 = vpack.c.bf16 %v2671_v8, %v2669_v7 }
  0x4b   : > { %3176 = vmatprep.subr.bf16.mxu1 %v3557_v1  ;;  %v2679_v9 = vld [vmem:[%s4419_s1 + $0x108] sm:$0xff]  ;;  %v1055_v14 = vld [vmem:[%s4421_s3 + $0x58] sm:$0xff]  ;;  %v1056_v19 = vld [vmem:[%s4421_s3 + $0x60] sm:$0xff] }
  0x4c   : > { %2646 = vmatmul.mubr.msk.f32.gmra.mrb[4].mxu0 %vm474_vm3, %v464_v32  ;;  %v673_v15 = vld [vmem:[%s3758_s20 + $0xa] sm:$0xff]  ;;  %v3160_v17 = vpack.c.bf16 %v2681_v12, %v2679_v9  ;;  %v3186_v18 = vpack.c.bf16 %v1055_v14, %v1054_v13  ;;  %v674_v21 = vld [vmem:[%s3758_s20 + $0x12] sm:$0xff]  ;;  %v2678_v22 = vld [vmem:[%s4419_s1 + $0x100] sm:$0xff] }
  0x4d   : > { %653 = vmatprep.mubr.f32.mxu0 %v3556_v0  ;;  %v1057_v20 = vld [vmem:[%s4421_s3 + $0x68] sm:$0xff]  ;;  %v2680_v23 = vld [vmem:[%s4419_s1 + $0x110] sm:$0xff]  ;;  %v2685_v26 = vld [vmem:[%s4419_s1 + $0x138] sm:$0xf] }
  0x4e   : > { %3178 = vmatpush1.bf16.msra.mxu1 %v3177_v55  ;;  %v2683_v24 = vld [vmem:[%s4419_s1 + $0x128] sm:$0xff]  ;;  %v3189_v25 = vpack.c.bf16 %v1057_v20, %v1056_v19  ;;  %v1058_v27 = vld [vmem:[%s4421_s3 + $0x70] sm:$0xff]  ;;  %v1059_v28 = vld [vmem:[%s4421_s3 + $0x78] sm:$0xff]  ;;  %v3162_v30 = vpack.c.bf16 %v2680_v23, %v2678_v22 }
  0x4f   : > { %3179 = vmatprep.subr.bf16.mxu1 %v3557_v1  ;;  %v788_v29 = vld [vmem:[%s3758_s20 + $0x3] sm:$0xff]  ;;  %v3164_v31 = vpack.c.bf16 %v2685_v26, %v2683_v24  ;;  %v2684_v33 = vld [vmem:[%s4419_s1 + $0x130] sm:$0xf]  ;;  %v3192_v34 = vpack.c.bf16 %v1059_v28, %v1058_v27  ;;  %v906_v40 = vld [vmem:[%s3758_s20 + $0x14] sm:$0xff] }
  0x50   : > { %2649 = vmatmul.mubr.msk.f32.vlgmr.msra.gmra.mrb[0].mxu0 %vm474_vm3, %v451_v42  ;;  %v2682_v32 = vld [vmem:[%s4419_s1 + $0x120] sm:$0xff]  ;;  %v789_v35 = vld [vmem:[%s3758_s20 + $0xb] sm:$0xff]  ;;  %v790_v37 = vld [vmem:[%s3758_s20 + $0x13] sm:$0xff] }
  0x51   : > { %659 = vmatprep.mubr.f32.mxu0 %v3556_v0  ;;  %3143 = vmatpush1.bf16.msra.mxu0 %v3142_v43  ;;  %v3167_v36 = vpack.c.bf16 %v2684_v33, %v2682_v32  ;;  %v904_v38 = vld [vmem:[%s3758_s20 + $0x4] sm:$0xff]  ;;  %v905_v39 = vld [vmem:[%s3758_s20 + $0xc] sm:$0xff]  ;;  %v1022_v43 = vlaneseq  ;;  %v1020_v46 = vld [vmem:[#allocation2] sm:$0x3]  ;;  %s445_s20 = scalar_lea.vmem [#allocation5], %s444_s14 }
  0x52   : > { %3146 = vmatprep.subr.msk.bf16.mxu0 %vm3737_vm2, %v3144_v44  ;;  %3181 = vmatpush1.bf16.msra.mxu1 %v3180_v62  ;;  %v1060_v11 = vld [vmem:[%s4421_s3 + $0x80] sm:$0xff]  ;;  %v1061_v41 = vld [vmem:[%s4421_s3 + $0x88] sm:$0xff]  ;;  %v2698_v9 = vld [vmem:[%s4421_s3 + $0xb0] sm:$0xff]  ;;  %s2559_s22 = sshll.u32 %s445_s20, 4  ;;  %s4377_s22 = int_to_ptr.vmem [resolvable:$true] %s2559_s22 }
  0x53   : > { %3182 = vmatprep.subr.bf16.mxu1 %v3557_v1  ;;  %v3195_v42 = vpack.c.bf16 %v1061_v41, %v1060_v11  ;;  %v1023_v44 = vshrl.u32 %v1022_v43, 7  ;;  %v2696_v62 = vld [vmem:[%s4421_s3 + $0xa0] sm:$0xff]  ;;  %v2697_v63 = vld [vmem:[%s4421_s3 + $0xa8] sm:$0xff]  ;;  %v2702_v19 = vld [vmem:[%s4421_s3 + $0xd0] sm:$0xff]  ;;  %s3487_s21 = scalar_lea.vmem %s4377_s22, 16  ;;  %p3494_p2 = scmp.lt.s32.totalorder %s4377_s22, %s3492_s17 }
  0x54   : > { %2650 = vmatmul.mubr.msk.f32.gmra.mrb[2].mxu0 %vm474_vm3, %v452_v52  ;;  %v2703_v20 = vld [vmem:[%s4421_s3 + $0xd8] sm:$0xff]  ;;  %v2704_v22 = vld [vmem:[%s4421_s3 + $0xe0] sm:$0xff]  ;;  %v2705_v23 = vld [vmem:[%s4421_s3 + $0xe8] sm:$0xff]  ;;  %p3488_p6 = scmp.ne.s32.totalorder %s4377_s22, %s3487_s21  ;;  %p3495_p3 = scmp.lt.s32.totalorder %s3493_s15, %s3487_s21 }
  0x55   : > { %665 = vmatprep.mubr.f32.mxu0 %v3556_v0  ;;  %3149 = vmatpush1.bf16.msk.msra.mxu0 %vm3737_vm2, %v3147_v53  ;;  %v1024_v45 = vsub.s32 0, %v1023_v44  ;;  %v1028_v47 = vsub.s32 1, %v1023_v44  ;;  %v2694_v53 = vld [vmem:[%s4421_s3 + $0x90] sm:$0xff]  ;;  %v3213_v24 = vpack.c.bf16 %v2705_v23, %v2704_v22  ;;  %v2707_v26 = vld [vmem:[%s4421_s3 + $0xf8] sm:$0xff]  ;;  %v2708_v28 = vld [vmem:[%s4421_s3 + $0x100] sm:$0xff] }
  0x56   : > { %3151 = vmatprep.subr.bf16.mxu0 %v3150_v54  ;;  %3184 = vmatpush1.bf16.msra.mxu1 %v3183_v10  ;;  %v2695_v54 = vld [vmem:[%s4421_s3 + $0x98] sm:$0xff]  ;;  %v2725_v11 = vld [vmem:[%s4423_s5 + $0x68] sm:$0xff]  ;;  %v2726_v41 = vld [vmem:[%s4423_s5 + $0x70] sm:$0xff]  ;;  %p3489_p10 = pnand %p3488_p6, %p4454_p9  ;;  %p3496_p4 = por %p3495_p3, %p3494_p2 }
  0x57   : > { %3185 = vmatprep.subr.bf16.mxu1 %v3557_v1  ;;  %v1025_v48 = vrot.slane %v1020_v46, %v1024_v45  ;;  %v1029_v49 = vrot.slane %v1020_v46, %v1028_v47  ;;  %v2699_v10 = vld [vmem:[%s4421_s3 + $0xb8] sm:$0xff]  ;;  %vm3322_vm12 = vmpackc.low %vm1899_vm11, %vm3558_vm1 }
  0x58   : > { %2651 = vmatmul.mubr.msk.f32.gmra.mrb[4].mxu0 %vm474_vm3, %v453_v58  ;;  %v3198_v58 = vpack.c.bf16 %v2695_v54, %v2694_v53  ;;  %v3204_v14 = vpack.c.bf16 %v2699_v10, %v2698_v9  ;;  %v2711_v32 = vld [vmem:[%s4421_s3 + $0x118] sm:$0xff]  ;;  %v2750_v10 = vld [vmem:[%s4425_s7 + $0x60] sm:$0xff]  ;;  %p3490_p12 = pneg %p3489_p10 }
  0x59   : > { %763 = vmatprep.mubr.f32.mxu0 %v3556_v0 }
  0x5a   : > { %3187 = vmatpush1.bf16.msra.mxu1 %v3186_v18  ;;  %p3497_p7 = pnand %p3496_p4, %p3490_p12 }
  0x5b   : > { %3188 = vmatprep.subr.bf16.mxu1 %v3557_v1 }
  0x5c   : > { %2662 = vmatmul.mubr.msk.f32.vlgmr.msra.gmra.mrb[0].mxu0 %vm474_vm3, %v672_v4 }
  0x5d   : > { %769 = vmatprep.mubr.f32.mxu0 %v3556_v0  ;;  %3153 = vmatpush1.bf16.msra.mxu0 %v3152_v5  ;;  %v3201_v5 = vpack.c.bf16 %v2697_v63, %v2696_v62  ;;  %v2727_v62 = vld [vmem:[%s4423_s5 + $0x78] sm:$0xff]  ;;  %v2728_v63 = vld [vmem:[%s4423_s5 + $0x80] sm:$0xff] }
  0x5e   : > { %3156 = vmatprep.subr.msk.bf16.mxu0 %vm3737_vm2, %v3154_v6  ;;  %3190 = vmatpush1.bf16.msra.mxu1 %v3189_v25  ;;  %v2706_v25 = vld [vmem:[%s4421_s3 + $0xf0] sm:$0xff] }
  0x5f   : > { %3191 = vmatprep.subr.bf16.mxu1 %v3557_v1  ;;  %v3216_v27 = vpack.c.bf16 %v2707_v26, %v2706_v25 }
  0x60   : > { %2663 = vmatmul.mubr.msk.f32.gmra.mrb[2].mxu0 %vm474_vm3, %v673_v15 }
  0x61   : > { %775 = vmatprep.mubr.f32.mxu0 %v3556_v0  ;;  %3159 = vmatpush1.bf16.msk.msra.mxu0 %vm3737_vm2, %v3157_v16  ;;  %v2700_v16 = vld [vmem:[%s4421_s3 + $0xc0] sm:$0xff] }
  0x62   : > { %3161 = vmatprep.subr.bf16.mxu0 %v3160_v17  ;;  %3193 = vmatpush1.bf16.msra.mxu1 %v3192_v34  ;;  %v2701_v17 = vld [vmem:[%s4421_s3 + $0xc8] sm:$0xff]  ;;  %v1254_v34 = vld [vmem:[%s4422_s4] sm:$0xff] }
  0x63   : > { %3194 = vmatprep.subr.bf16.mxu1 %v3557_v1  ;;  %v3207_v18 = vpack.c.bf16 %v2701_v17, %v2700_v16  ;;  %v2754_v17 = vld [vmem:[%s4425_s7 + $0x80] sm:$0xff] }
  0x64   : > { %2664 = vmatmul.mubr.msk.f32.gmra.mrb[4].mxu0 %vm474_vm3, %v674_v21  ;;  %v3210_v21 = vpack.c.bf16 %v2703_v20, %v2702_v19 }
  0x65   : > { %879 = vmatprep.mubr.f32.mxu0 %v3556_v0 }
  0x66   : > { %3196 = vmatpush1.bf16.msra.mxu1 %v3195_v42  ;;  %v3240_v42 = vpack.c.bf16 %v2726_v41, %v2725_v11  ;;  %v1432_v11 = vld [vmem:[%s4423_s5 + $0x40] sm:$0xff]  ;;  %v2734_v41 = vld [vmem:[%s4423_s5 + $0x90] sm:$0xff] }
  0x67   : > { %3197 = vmatprep.subr.bf16.mxu1 %v3557_v1 }
  0x68   : > { %2675 = vmatmul.mubr.msk.f32.vlgmr.msra.gmra.mrb[0].mxu0 %vm474_vm3, %v788_v29  ;;  %v2709_v29 = vld [vmem:[%s4421_s3 + $0x108] sm:$0xff] }
  0x69   : > { %885 = vmatprep.mubr.f32.mxu0 %v3556_v0  ;;  %3163 = vmatpush1.bf16.msra.mxu0 %v3162_v30  ;;  %v3219_v30 = vpack.c.bf16 %v2709_v29, %v2708_v28  ;;  %v1426_v28 = vld [vmem:[%s4423_s5 + $0x10] sm:$0xff]  ;;  %v1427_v29 = vld [vmem:[%s4423_s5 + $0x18] sm:$0xff] }
  0x6a   : > { %3166 = vmatprep.subr.msk.bf16.mxu0 %vm3737_vm2, %v3164_v31  ;;  %v2710_v31 = vld [vmem:[%s4421_s3 + $0x110] sm:$0xff] }
  0x6b   : > { %v3222_v33 = vpack.c.bf16 %v2711_v32, %v2710_v31 }
  0x6c   : > { %2676 = vmatmul.mubr.msk.f32.gmra.mrb[2].mxu0 %vm474_vm3, %v789_v35  ;;  %v2721_v35 = vld [vmem:[%s4423_s5 + $0x48] sm:$0xff] }
  0x6d   : > { %891 = vmatprep.mubr.f32.mxu0 %v3556_v0  ;;  %3169 = vmatpush1.bf16.msk.msra.mxu0 %vm3737_vm2, %v3167_v36  ;;  %v2722_v36 = vld [vmem:[%s4423_s5 + $0x50] sm:$0xff] }
  0x70   : > { %2677 = vmatmul.mubr.msk.f32.gmra.mrb[4].mxu0 %vm474_vm3, %v790_v37  ;;  %v2723_v37 = vld [vmem:[%s4423_s5 + $0x58] sm:$0xff] }
  0x71   : > { %995 = vmatprep.mubr.f32.mxu0 %v3556_v0 }
  0x74   : > { %2688 = vmatmul.mubr.msk.f32.vlgmr.msra.gmra.mrb[0].mxu0 %vm474_vm3, %v904_v38  ;;  %v3232_v38 = vpack.c.bf16 %v2722_v36, %v2721_v35  ;;  %v1428_v35 = vld [vmem:[%s4423_s5 + $0x20] sm:$0xff]  ;;  %v1429_v36 = vld [vmem:[%s4423_s5 + $0x28] sm:$0xff] }
  0x75   : > { %1001 = vmatprep.mubr.f32.mxu0 %v3556_v0 }
  0x78   : > { %2689 = vmatmul.mubr.msk.f32.gmra.mrb[2].mxu0 %vm474_vm3, %v905_v39  ;;  %v2724_v39 = vld [vmem:[%s4423_s5 + $0x60] sm:$0xff] }
  0x79   : > { %1007 = vmatprep.mubr.f32.mxu0 %v3556_v0 }
  0x7c   : > { %2690 = vmatmul.mubr.msk.f32.gmra.mrb[4].mxu0 %vm474_vm3, %v906_v40  ;;  %v3236_v40 = vpack.c.bf16 %v2724_v39, %v2723_v37  ;;  %v3256_v37 = vpack.c.bf16 %v1429_v36, %v1428_v35  ;;  %v1431_v39 = vld [vmem:[%s4423_s5 + $0x38] sm:$0xff]  ;;  %v2452_v35 = vld [vmem:[%s4429_s11 + $0x8] sm:$0xff] }
  0x7d   : > { %2909 = vmatprep.mubr.msk.f32.mxu0 %vm1256_vm5, %v1254_v34 }
 0x147   : > { %v997_v50 = vpop.f32.mrb[0].mxu0 }
 0x148   : > { %v3975_v51 = vadd.f32 %v1025_v48, %v997_v50  ;;  %v999_v52 = vpop.f32.mrb[1].mxu0 }
 0x149   : > { %v1033_v55 = vadd.f32 %v1029_v49, %v999_v52 }
 0x14a   : > { %v1038_v59 = vmax.f32 %v3975_v51, 0.0 }
 0x14b   : > { %v1039_v56 = vmax.f32 %v1033_v55, 0.0  ;;  %v1003_v57 = vpop.f32.mrb[2].mxu0 }
 0x14c   : > { %v1034_v60 = vadd.f32 %v1025_v48, %v1003_v57  ;;  %v1005_v61 = vpop.f32.mrb[3].mxu0 }
 0x14d   : > { %v1035_v2 = vadd.f32 %v1029_v49, %v1005_v61  ;;  %2691 = vmatprep.mubr.msk.f32.mxu1 %vm1062_vm4, %v1039_v56  ;;  %v2718_v61 = vld [vmem:[%s4422_s4 + $0x18] sm:$0xf] }
 0x14e   : > { %1137 = vmatmul.mubr.f32.vlgmr.msra.gmra.mrb[0].mxu1 %v1038_v59  ;;  %v1040_v6 = vmax.f32 %v1034_v60, 0.0  ;;  %v2717_v60 = vld [vmem:[%s4422_s4 + $0x10] sm:$0xff] }
 0x14f   : > { %v1041_v3 = vmax.f32 %v1035_v2, 0.0  ;;  %3199 = vmatpush1.bf16.msra.mxu1 %v3198_v58  ;;  %v1009_v4 = vpop.f32.mrb[4].mxu0  ;;  %v3244_v2 = vpack.c.bf16 %v2728_v63, %v2727_v62  ;;  %v1720_v63 = vld [vmem:[%s4425_s7 + $0x30] sm:$0xff] }
 0x150   : > { %v1036_v7 = vadd.f32 %v1025_v48, %v1009_v4  ;;  %v1011_v8 = vpop.f32.mrb[5].mxu0  ;;  %3200 = vmatprep.subr.bf16.mxu1 %v3557_v1  ;;  %v1424_v4 = vld [vmem:[%s4423_s5] sm:$0xff] }
 0x151   : > { %v1037_v12 = vadd.f32 %v1029_v49, %v1011_v8  ;;  %2692 = vmatprep.mubr.msk.f32.mxu1 %vm1062_vm4, %v1041_v3  ;;  %v2749_v8 = vld [vmem:[%s4425_s7 + $0x58] sm:$0xff] }
 0x152   : > { %1142 = vmatmul.mubr.f32.gmra.mrb[2].mxu1 %v1040_v6  ;;  %v1042_v15 = vmax.f32 %v1036_v7, 0.0  ;;  %v2748_v7 = vld [vmem:[%s4425_s7 + $0x50] sm:$0xff] }
 0x153   : > { %v1043_v13 = vmax.f32 %v1037_v12, 0.0  ;;  %3202 = vmatpush1.bf16.msra.mxu1 %v3201_v5  ;;  %v1425_v5 = vld [vmem:[%s4423_s5 + $0x8] sm:$0xff]  ;;  %v3300_v9 = vpack.c.bf16 %v2749_v8, %v2748_v7  ;;  %v2756_v7 = vld [vmem:[%s4425_s7 + $0x90] sm:$0xff]  ;;  %v2757_v8 = vld [vmem:[%s4425_s7 + $0x98] sm:$0xff] }
 0x154   : > { %3203 = vmatprep.subr.bf16.mxu1 %v3557_v1  ;;  %v2751_v12 = vld [vmem:[%s4425_s7 + $0x68] sm:$0xff] }
 0x155   : > { %2693 = vmatprep.mubr.msk.f32.mxu1 %vm1062_vm4, %v1043_v13 }
 0x156   : > { %1147 = vmatmul.mubr.f32.gmra.mrb[4].mxu1 %v1042_v15 }
 0x157   : > { %3205 = vmatpush1.bf16.msra.mxu1 %v3204_v14  ;;  %2712 = vmatprep.mubr.msk.f32.mxu1 %vm1062_vm4, %v1039_v56  ;;  %v2752_v14 = vld [vmem:[%s4425_s7 + $0x70] sm:$0xff] }
 0x158   : > { %3206 = vmatprep.subr.bf16.mxu1 %v3557_v1 }
 0x15b   : > { %3208 = vmatpush1.bf16.msra.mxu1 %v3207_v18  ;;  %v2755_v18 = vld [vmem:[%s4425_s7 + $0x88] sm:$0xff] }
 0x15c   : > { %3209 = vmatprep.subr.bf16.mxu1 %v3557_v1  ;;  %v3312_v19 = vpack.c.bf16 %v2755_v18, %v2754_v17 }
 0x15f   : > { %3211 = vmatpush1.bf16.msra.mxu1 %v3210_v21 }
 0x160   : > { %3212 = vmatprep.subr.bf16.mxu1 %v3557_v1 }
 0x163   : > { %3214 = vmatpush1.bf16.msra.mxu1 %v3213_v24 }
 0x164   : > { %3215 = vmatprep.subr.bf16.mxu1 %v3557_v1 }
 0x167   : > { %3217 = vmatpush1.bf16.msra.mxu1 %v3216_v27 }
 0x168   : > { %3218 = vmatprep.subr.bf16.mxu1 %v3557_v1 }
 0x16b   : > { %3220 = vmatpush1.bf16.msra.mxu1 %v3219_v30 }
 0x16c   : > { %3221 = vmatprep.subr.bf16.mxu1 %v3557_v1 }
 0x16f   : > { %3223 = vmatpush1.bf16.msra.mxu1 %v3222_v33  ;;  %v3252_v33 = vpack.c.bf16 %v1427_v29, %v1426_v28  ;;  %v2762_v28 = vld [vmem:[%s4426_s8 + $0x8] sm:$0x1f] }
 0x170   : > { %3233 = vmatprep.subr.bf16.mxu1 %v3232_v38 }
 0x172   : > { %1236 = vmatmul.mubr.f32.vlgmr.msra.gmra.mrb[6].mxu1 %v1038_v59  ;;  %v1255_v59 = vld [vmem:[%s4422_s4 + $0x8] sm:$0xf] }
 0x173   : > { %2713 = vmatprep.mubr.msk.f32.mxu1 %vm1062_vm4, %v1041_v3  ;;  %3235 = vmatpush3.bf16.msra.mxu1 %v3232_v38  ;;  %v2729_v3 = vld [vmem:[%s4423_s5 + $0x88] sm:$0xff]  ;;  %v1430_v38 = vld [vmem:[%s4423_s5 + $0x30] sm:$0xff] }
 0x174   : > { %3237 = vmatprep.subr.bf16.mxu1 %v3236_v40 }
 0x176   : > { %1241 = vmatmul.mubr.f32.gmra.mrb[8].mxu1 %v1040_v6  ;;  %v3248_v6 = vpack.c.bf16 %v1425_v5, %v1424_v4  ;;  %v1722_v4 = vld [vmem:[%s4425_s7 + $0x40] sm:$0xff]  ;;  %v1723_v5 = vld [vmem:[%s4425_s7 + $0x48] sm:$0xff] }
 0x177   : > { %2714 = vmatprep.mubr.msk.f32.mxu1 %vm1062_vm4, %v1043_v13  ;;  %3239 = vmatpush3.bf16.msra.mxu1 %v3236_v40  ;;  %v3304_v13 = vpack.c.bf16 %v2751_v12, %v2750_v10  ;;  %v3260_v40 = vpack.c.bf16 %v1431_v39, %v1430_v38  ;;  %v2745_v10 = vld [vmem:[%s4424_s6] ss:$0 sm:$0xff]  ;;  %v2766_v39 = vld [vmem:[%s4427_s9 + $0x28] sm:$0xff] }
 0x178   : > { %3241 = vmatprep.subr.bf16.mxu1 %v3240_v42 }
 0x17a   : > { %1246 = vmatmul.mubr.f32.gmra.mrb[10].mxu1 %v1042_v15  ;;  %v2753_v15 = vld [vmem:[%s4425_s7 + $0x78] sm:$0xff] }
 0x17b   : > { %3243 = vmatpush3.bf16.msra.mxu1 %v3240_v42  ;;  %v3308_v16 = vpack.c.bf16 %v2753_v15, %v2752_v14  ;;  %v2735_v42 = vld [vmem:[%s4423_s5 + $0x98] sm:$0xff] }
 0x17c   : > { %3245 = vmatprep.subr.bf16.mxu1 %v3244_v2 }
 0x17f   : > { %3247 = vmatpush3.bf16.msra.mxu1 %v3244_v2  ;;  %v1721_v2 = vld [vmem:[%s4425_s7 + $0x38] sm:$0xff] }
 0x180   : > { %2937 = vmatprep.subr.mxu1 %v2729_v3 }
 0x183   : > { %2938 = vmatpush3.msra.mxu1 %v2729_v3  ;;  %v3292_v3 = vpack.c.bf16 %v1721_v2, %v1720_v63  ;;  %v2784_v63 = vld [vmem:[%s4427_s9 + $0xa0] sm:$0xff]  ;;  %v2785_v2 = vld [vmem:[%s4427_s9 + $0xa8] sm:$0xff] }
 0x184   : > { %3249 = vmatprep.subr.bf16.mxu1 %v3248_v6 }
 0x221   : > { %v1138_v43 = vpop.f32.mrb[0].mxu1 }
 0x222   : > { %v1140_v44 = vpop.f32.mrb[1].mxu1 }
 0x223   : > { %v2737_v44 = vld [vmem:[%s4423_s5 + $0xa8] sm:$0xff] }
 0x225   : > { %v1143_v45 = vpop.f32.mrb[2].mxu1 }
 0x226   : > { %v1145_v46 = vpop.f32.mrb[3].mxu1 }
 0x229   : > { %v1148_v47 = vpop.f32.mrb[4].mxu1 }
 0x22a   : > { %v1150_v48 = vpop.f32.mrb[5].mxu1 }
 0x22b   : > { %v2739_v48 = vld [vmem:[%s4423_s5 + $0xb8] sm:$0xff] }
 0x245   : > { %v1237_v49 = vpop.f32.mrb[6].mxu1 }
 0x246   : > { %v1251_v50 = vmax.f32 %v1138_v43, %v1237_v49  ;;  %v1239_v51 = vpop.f32.mrb[7].mxu1  ;;  %v2736_v43 = vld [vmem:[%s4423_s5 + $0xa0] sm:$0xff] }
 0x247   : > { %v3268_v46 = vpack.c.bf16 %v2737_v44, %v2736_v43  ;;  %v2741_v51 = vld [vmem:[%s4423_s5 + $0xc8] sm:$0xff]  ;;  %v2768_v44 = vld [vmem:[%s4427_s9 + $0x38] sm:$0xff] }
 0x249   : > { %v1242_v52 = vpop.f32.mrb[8].mxu1 }
 0x24a   : > { %v1252_v53 = vmax.f32 %v1143_v45, %v1242_v52  ;;  %v1244_v54 = vpop.f32.mrb[9].mxu1  ;;  %v3264_v45 = vpack.c.bf16 %v2735_v42, %v2734_v41 }
 0x24b   : > { %v1714_v54 = vld [vmem:[%s4425_s7] sm:$0xff] }
 0x24c   : > { %v3224_v55 = vpack.c.bf16 %v1252_v53, %v1251_v50  ;;  %v2740_v50 = vld [vmem:[%s4423_s5 + $0xc0] sm:$0xff]  ;;  %v2742_v53 = vld [vmem:[%s4423_s5 + $0xd0] sm:$0xff] }
 0x24d   : > { %v1247_v56 = vpop.f32.mrb[10].mxu1  ;;  %v3276_v52 = vpack.c.bf16 %v2741_v51, %v2740_v50 }
 0x24e   : > { %v1253_v57 = vmax.f32 %v1148_v47, %v1247_v56  ;;  %v1249_v58 = vpop.f32.mrb[11].mxu1  ;;  %3225 = vmatprep.subr.bf16.mxu0 %v3224_v55  ;;  %v2738_v47 = vld [vmem:[%s4423_s5 + $0xb0] sm:$0xff] }
 0x24f   : > { %3227 = vmatpush3.bf16.msra.mxu0 %v3224_v55  ;;  %v3272_v49 = vpack.c.bf16 %v2739_v48, %v2738_v47  ;;  %v1716_v56 = vld [vmem:[%s4425_s7 + $0x10] sm:$0xff]  ;;  %v2773_v48 = vld [vmem:[%s4427_s9 + $0x58] sm:$0xff] }
 0x250   : > { %2907 = vmatprep.subr.mxu0 %v1253_v57  ;;  %v2772_v47 = vld [vmem:[%s4427_s9 + $0x50] sm:$0xff] }
 0x251   : > { %v3341_v50 = vpack.c.bf16 %v2773_v48, %v2772_v47 }
 0x253   : > { %2908 = vmatpush3.msra.mxu0 %v1253_v57 }
 0x254   : > { %3229 = vmatprep.subr.bf16.mxu0 %v3224_v55  ;;  %2910 = vmatmul.mubr.msk.f32.vlgmr.msra.gmra.mrb[6].mxu0 %vm1256_vm5, %v1255_v59 }
 0x255   : > { %3231 = vmatpush3.bf16.msra.mxu0 %v3224_v55  ;;  %2918 = vmatprep.mubr.msk.f32.mxu0 %vm1256_vm5, %v2717_v60  ;;  %v1715_v55 = vld [vmem:[%s4425_s7 + $0x8] sm:$0xff]  ;;  %v1718_v60 = vld [vmem:[%s4425_s7 + $0x20] sm:$0xff] }
 0x256   : > { %2916 = vmatprep.subr.mxu0 %v1253_v57  ;;  %v3280_v58 = vpack.c.bf16 %v1715_v55, %v1714_v54  ;;  %v2778_v55 = vld [vmem:[%s4427_s9 + $0x78] sm:$0xff] }
 0x259   : > { %2917 = vmatpush3.msra.mxu0 %v1253_v57  ;;  %v1717_v57 = vld [vmem:[%s4425_s7 + $0x18] sm:$0xff] }
 0x25a   : > { %2919 = vmatmul.mubr.msk.f32.vlgmr.msra.gmra.mrb[8].mxu0 %vm1256_vm5, %v2718_v61  ;;  %3301 = vmatprep.subr.bf16.mxu0 %v3300_v9  ;;  %v3284_v59 = vpack.c.bf16 %v1717_v57, %v1716_v56  ;;  %v1719_v61 = vld [vmem:[%s4425_s7 + $0x28] sm:$0xff]  ;;  %v2779_v56 = vld [vmem:[%s4427_s9 + $0x80] sm:$0xff]  ;;  %v2776_v57 = vld [vmem:[%s4427_s9 + $0x70] sm:$0xff] }
 0x25b   : > { %3303 = vmatpush3.bf16.msra.mxu0 %v3300_v9  ;;  %v3288_v62 = vpack.c.bf16 %v1719_v61, %v1718_v60  ;;  %v3316_v9 = vpack.c.bf16 %v2757_v8, %v2756_v7  ;;  %v2780_v60 = vld [vmem:[%s4427_s9 + $0x88] sm:$0xff]  ;;  %v2781_v61 = vld [vmem:[%s4427_s9 + $0x90] sm:$0xff]  ;;  %v2787_v7 = vld [vmem:[%s4427_s9 + $0xb8] sm:$0xff] }
 0x25c   : > { %3305 = vmatprep.subr.bf16.mxu0 %v3304_v13 }
 0x25f   : > { %3307 = vmatpush3.bf16.msra.mxu0 %v3304_v13 }
 0x260   : > { %3309 = vmatprep.subr.bf16.mxu0 %v3308_v16 }
 0x263   : > { %3311 = vmatpush3.bf16.msra.mxu0 %v3308_v16 }
 0x264   : > { %3313 = vmatprep.subr.bf16.mxu0 %v3312_v19 }
 0x267   : > { %3315 = vmatpush3.bf16.msra.mxu0 %v3312_v19 }
 0x268   : > { %3317 = vmatprep.subr.bf16.mxu0 %v3316_v9 }
 0x26b   : > { %3319 = vmatpush3.bf16.msra.mxu0 %v3316_v9  ;;  %v2788_v9 = vld [vmem:[%s4427_s9 + $0xc0] sm:$0xff] }
 0x26c   : > { %3320 = vmatprep.subr.bf16.mxu0 %v3557_v1 }
 0x327   : > { %v2911_v20 = vpop.f32.mrb[6].mxu0 }
 0x328   : > { %v1329_v21 = vpop.f32.mrb[7].mxu0 }
 0x32d   : > { %v2920_v22 = vpop.f32.mrb[8].mxu0 }
 0x32e   : > { %v4119_v23 = vmax.f32 %v2911_v20, %v2920_v22  ;;  %v1413_v24 = vpop.f32.mrb[9].mxu0 }
 0x32f   : > { %v1422_v25 = vmax.f32 %v1329_v21, %v1413_v24 }
 0x330   : > { %v1447_v26 = vrot.slane %v4119_v23, 1  ;;  %v1620_v27 = vrot.slane %v4119_v23, 2 }
 0x331   : > { %v1446_v30 = vrot.slane %v1422_v25, 1  ;;  %v1619_v31 = vrot.slane %v1422_v25, 2 }
 0x333   : > { %v1448_v32 = vsel %vm1445_vm6, %v1446_v30, %v1447_v26  ;;  %v1621_v34 = vsel %vm1618_vm7, %v1619_v31, %v1620_v27  ;;  %v2052_v30 = vld [vmem:[%s4427_s9 + $0x10] sm:$0xff]  ;;  %v2053_v31 = vld [vmem:[%s4427_s9 + $0x18] sm:$0xff] }
 0x334   : > { %2939 = vmatprep.mubr.msk.f32.mxu1 %vm1449_vm8, %v1448_v32  ;;  %v3332_v32 = vpack.c.bf16 %v2053_v31, %v2052_v30 }
 0x335   : > { %2940 = vmatmul.mubr.msk.f32.vlgmr.msra.gmra.mrb[12].mxu1 %vm1449_vm8, %v1447_v26  ;;  %v2050_v26 = vld [vmem:[%s4427_s9] sm:$0xff] }
 0x336   : > { %3251 = vmatpush3.bf16.msra.mxu1 %v3248_v6  ;;  %2960 = vmatprep.mubr.msk.f32.mxu1 %vm1449_vm8, %v1422_v25  ;;  %v3296_v6 = vpack.c.bf16 %v1723_v5, %v1722_v4  ;;  %v1894_v25 = vld [vmem:[%s4426_s8] sm:$0x1f]  ;;  %v3353_v4 = vpack.c.bf16 %v2785_v2, %v2784_v63 }
 0x337   : > { %3253 = vmatprep.subr.bf16.mxu1 %v3252_v33 }
 0x33a   : > { %3255 = vmatpush3.bf16.msra.mxu1 %v3252_v33  ;;  %v2054_v33 = vld [vmem:[%s4427_s9 + $0x20] sm:$0xff] }
 0x33b   : > { %3257 = vmatprep.subr.bf16.mxu1 %v3256_v37 }
 0x33e   : > { %3259 = vmatpush3.bf16.msra.mxu1 %v3256_v37 }
 0x33f   : > { %3261 = vmatprep.subr.bf16.mxu1 %v3260_v40 }
 0x342   : > { %3263 = vmatpush3.bf16.msra.mxu1 %v3260_v40  ;;  %v2767_v40 = vld [vmem:[%s4427_s9 + $0x30] sm:$0xff] }
 0x343   : > { %2958 = vmatprep.subr.mxu1 %v1432_v11  ;;  %v3335_v41 = vpack.c.bf16 %v2767_v40, %v2766_v39 }
 0x346   : > { %2959 = vmatpush3.msra.mxu1 %v1432_v11 }
 0x347   : > { %2961 = vmatmul.mubr.msk.f32.vlgmr.msra.gmra.mrb[12].mxu1 %vm1449_vm8, %v4119_v23  ;;  %3265 = vmatprep.subr.bf16.mxu1 %v3264_v45 }
 0x348   : > { %3267 = vmatpush3.bf16.msra.mxu1 %v3264_v45  ;;  %2981 = vmatprep.mubr.msk.f32.mxu1 %vm1449_vm8, %v1621_v34  ;;  %v2451_v34 = vld [vmem:[%s4429_s11] sm:$0xff] }
 0x349   : > { %3269 = vmatprep.subr.bf16.mxu1 %v3268_v46  ;;  %v3359_v36 = vpack.c.bf16 %v2452_v35, %v2451_v34  ;;  %v2769_v45 = vld [vmem:[%s4427_s9 + $0x40] sm:$0xff] }
 0x34c   : > { %3271 = vmatpush3.bf16.msra.mxu1 %v3268_v46  ;;  %v3338_v46 = vpack.c.bf16 %v2769_v45, %v2768_v44 }
 0x34d   : > { %3273 = vmatprep.subr.bf16.mxu1 %v3272_v49 }
 0x350   : > { %3275 = vmatpush3.bf16.msra.mxu1 %v3272_v49  ;;  %v2770_v49 = vld [vmem:[%s4427_s9 + $0x48] sm:$0xff] }
 0x351   : > { %3277 = vmatprep.subr.bf16.mxu1 %v3276_v52 }
 0x354   : > { %3279 = vmatpush3.bf16.msra.mxu1 %v3276_v52  ;;  %v2774_v52 = vld [vmem:[%s4427_s9 + $0x60] sm:$0xff] }
 0x355   : > { %2979 = vmatprep.subr.mxu1 %v2742_v53 }
 0x358   : > { %2980 = vmatpush3.msra.mxu1 %v2742_v53  ;;  %v2775_v53 = vld [vmem:[%s4427_s9 + $0x68] sm:$0xff] }
 0x359   : > { %2982 = vmatmul.mubr.msk.f32.vlgmr.msra.gmra.mrb[12].mxu1 %vm1449_vm8, %v1620_v27  ;;  %3281 = vmatprep.subr.bf16.mxu1 %v3280_v58  ;;  %v2051_v27 = vld [vmem:[%s4427_s9 + $0x8] sm:$0xff]  ;;  %v3344_v54 = vpack.c.bf16 %v2775_v53, %v2774_v52 }
 0x35a   : > { %3283 = vmatpush3.bf16.msra.mxu1 %v3280_v58  ;;  %v3329_v29 = vpack.c.bf16 %v2051_v27, %v2050_v26  ;;  %v3347_v58 = vpack.c.bf16 %v2779_v56, %v2778_v55 }
 0x35b   : > { %3285 = vmatprep.subr.bf16.mxu1 %v3284_v59 }
 0x35e   : > { %3287 = vmatpush3.bf16.msra.mxu1 %v3284_v59 }
 0x35f   : > { %3289 = vmatprep.subr.bf16.mxu1 %v3288_v62 }
 0x362   : > { %3291 = vmatpush3.bf16.msra.mxu1 %v3288_v62  ;;  %v3350_v62 = vpack.c.bf16 %v2781_v61, %v2780_v60 }
 0x363   : > { %3293 = vmatprep.subr.bf16.mxu1 %v3292_v3 }
 0x366   : > { %3295 = vmatpush3.bf16.msra.mxu1 %v3292_v3  ;;  %v2782_v3 = vld [vmem:[%s4427_s9 + $0x98] sm:$0xff] }
 0x367   : > { %3297 = vmatprep.subr.bf16.mxu1 %v3296_v6 }
 0x36a   : > { %3299 = vmatpush3.bf16.msra.mxu1 %v3296_v6  ;;  %v2786_v6 = vld [vmem:[%s4427_s9 + $0xb0] sm:$0xff] }
 0x36b   : > { %3358 = vmatprep.subr.bf16.mxu1 %v3557_v1  ;;  %v3356_v8 = vpack.c.bf16 %v2787_v7, %v2786_v6 }
 0x42c   : > { %v2983_v12 = vpop.f32.mrb[12].mxu1 }
 0x42d   : > { %v1711_v13 = vadd.f32 %v2983_v12, %v2745_v10  ;;  %v1692_v14 = vpop.f32.mrb[13].mxu1  ;;  %v2453_v12 = vld [vmem:[%s4429_s11 + $0x10] sm:$0xff] }
 0x42e   : > { %v1710_v15 = vadd.f32 %v2745_v10, %v1692_v14 }
 0x42f   : > { %v1713_v17 = vmax.f32 %v1711_v13, 0.0 }
 0x430   : > { %v1712_v16 = vmax.f32 %v1710_v15, 0.0 }
 0x432   : > { %3004 = vmatprep.mubr.msk.f32.mxu1 %vm1724_vm9, %v1712_v16  ;;  %3027 = vmatprep.mubr.msk.f32.mxu0 %vm1724_vm9, %v1712_v16 }
 0x433   : > { %3005 = vmatmul.mubr.msk.f32.vlgmr.msra.gmra.mrb[14].mxu1 %vm1724_vm9, %v1713_v17  ;;  %3028 = vmatmul.mubr.msk.f32.vlgmr.msra.gmra.mrb[10].mxu0 %vm1724_vm9, %v1713_v17 }
 0x434   : > { %3034 = vmatprep.mubr.msk.f32.mxu0 %vm3559_vm10, %v3556_v0  ;;  %3117 = vmatprep.mubr.msk.f32.mxu1 %vm3559_vm10, %v3556_v0 }
 0x435   : > { %3360 = vmatpush3.bf16.msra.mxu1 %v3359_v36 }
 0x436   : > { %3361 = vmatprep.subr.bf16.mxu1 %v3557_v1 }
 0x506   : > { %v3006_v18 = vpop.f32.mrb[14].mxu1  ;;  %v3029_v19 = vpop.f32.mrb[10].mxu0 }
 0x507   : > { %v1893_v20 = vmax.f32 %v3006_v18, %v3029_v19  ;;  %v1797_v21 = vpop.f32.mrb[15].mxu1  ;;  %v1883_v22 = vpop.f32.mrb[11].mxu0  ;;  %v2455_v18 = vld [vmem:[%s4430_s12] sm:$0x1] }
 0x508   : > { %v1892_v23 = vmax.f32 %v1797_v21, %v1883_v22 }
 0x50a   : > { %v3321_v24 = vpack.c.bf16 %v1893_v20, %v1892_v23 }
 0x50c   : > { %3323 = vmatpush3.bf16.msk.msra.mxu0 %vm3322_vm12, %v3321_v24 }
 0x50d   : > { %3324 = vmatprep.subr.bf16.mxu0 %v3557_v1 }
 0x50f   : > { %3035 = vmatmul.mubr.msk.f32.vlgmr.msra.gmra.mrb[12].mxu0 %vm1895_vm13, %v1894_v25 }
 0x510   : > { %3327 = vmatpush3.bf16.msk.msra.mxu0 %vm3322_vm12, %v3321_v24  ;;  %3041 = vmatprep.mubr.msk.f32.mxu0 %vm3559_vm10, %v3556_v0 }
 0x511   : > { %3328 = vmatprep.subr.bf16.mxu0 %v3557_v1 }
 0x513   : > { %3042 = vmatmul.mubr.msk.f32.vlgmr.msra.gmra.mrb[14].mxu0 %vm1895_vm13, %v2762_v28 }
 0x514   : > { %3330 = vmatpush3.bf16.msra.mxu0 %v3329_v29  ;;  %3054 = vmatprep.mubr.msk.f32.mxu0 %vm3559_vm10, %v3556_v0 }
 0x515   : > { %3331 = vmatprep.subr.bf16.mxu0 %v3557_v1 }
 0x518   : > { %3333 = vmatpush3.bf16.msra.mxu0 %v3332_v32 }
 0x519   : > { %3052 = vmatprep.subr.mxu0 %v3556_v0 }
 0x51c   : > { %3053 = vmatpush3.msra.mxu0 %v2054_v33 }
 0x51d   : > { %3334 = vmatprep.subr.bf16.mxu0 %v3557_v1 }
 0x5e2   : > { %v1969_v37 = vpop.f32.mrb[12].mxu0 }
 0x5e3   : > { %v3036_v38 = vpop.f32.mrb[13].mxu0 }
 0x5e6   : > { %v2044_v11 = vpop.f32.mrb[14].mxu0 }
 0x5e7   : > { %v4271_v42 = vmax.f32 %v1969_v37, %v2044_v11  ;;  %v3043_v43 = vpop.f32.mrb[15].mxu0 }
 0x5e9   : > { %3055 = vmatmul.mubr.msk.f32.vlgmr.msra.gmra.mrb[16].mxu0 %vm2055_vm14, %v4271_v42  ;;  %v2136_v51 = vrot.slane %v4271_v42, 1  ;;  %v2216_v59 = vrot.slane %v4271_v42, 2  ;;  %v2296_v5 = vrot.slane %v4271_v42, 3  ;;  %v2376_v10 = vrot.slane %v4271_v42, 4 }
 0x5ea   : > { %3336 = vmatpush3.bf16.msra.mxu0 %v3335_v41  ;;  %3067 = vmatprep.mubr.msk.f32.mxu0 %vm3559_vm10, %v3556_v0 }
 0x5eb   : > { %3337 = vmatprep.subr.bf16.mxu0 %v3557_v1 }
 0x5ee   : > { %3339 = vmatpush3.bf16.msra.mxu0 %v3338_v46 }
 0x5ef   : > { %3065 = vmatprep.subr.mxu0 %v3556_v0 }
 0x5f2   : > { %3066 = vmatpush3.msra.mxu0 %v2770_v49 }
 0x5f3   : > { %3068 = vmatmul.mubr.msk.f32.vlgmr.msra.gmra.mrb[16].mxu0 %vm2055_vm14, %v2136_v51  ;;  %3340 = vmatprep.subr.bf16.mxu0 %v3557_v1 }
 0x5f4   : > { %3342 = vmatpush3.bf16.msra.mxu0 %v3341_v50  ;;  %3080 = vmatprep.mubr.msk.f32.mxu0 %vm3559_vm10, %v3556_v0 }
 0x5f5   : > { %3343 = vmatprep.subr.bf16.mxu0 %v3557_v1 }
 0x5f8   : > { %3345 = vmatpush3.bf16.msra.mxu0 %v3344_v54 }
 0x5f9   : > { %3078 = vmatprep.subr.mxu0 %v3556_v0 }
 0x5fc   : > { %3079 = vmatpush3.msra.mxu0 %v2776_v57 }
 0x5fd   : > { %3081 = vmatmul.mubr.msk.f32.vlgmr.msra.gmra.mrb[16].mxu0 %vm2055_vm14, %v2216_v59  ;;  %3346 = vmatprep.subr.bf16.mxu0 %v3557_v1 }
 0x5fe   : > { %3348 = vmatpush3.bf16.msra.mxu0 %v3347_v58  ;;  %3093 = vmatprep.mubr.msk.f32.mxu0 %vm3559_vm10, %v3556_v0 }
 0x5ff   : > { %3349 = vmatprep.subr.bf16.mxu0 %v3557_v1 }
 0x602   : > { %3351 = vmatpush3.bf16.msra.mxu0 %v3350_v62 }
 0x603   : > { %3091 = vmatprep.subr.mxu0 %v3556_v0 }
 0x606   : > { %3092 = vmatpush3.msra.mxu0 %v2782_v3 }
 0x607   : > { %3094 = vmatmul.mubr.msk.f32.vlgmr.msra.gmra.mrb[16].mxu0 %vm2055_vm14, %v2296_v5  ;;  %3352 = vmatprep.subr.bf16.mxu0 %v3557_v1 }
 0x608   : > { %3354 = vmatpush3.bf16.msra.mxu0 %v3353_v4  ;;  %3106 = vmatprep.mubr.msk.f32.mxu0 %vm3559_vm10, %v3556_v0 }
 0x609   : > { %3355 = vmatprep.subr.bf16.mxu0 %v3557_v1  ;;  %v2454_v1 = vld [vmem:[%s4429_s11 + $0x18] sm:$0xff] }
 0x60a   : > { %v3362_v13 = vpack.c.bf16 %v2454_v1, %v2453_v12 }
 0x60c   : > { %3357 = vmatpush3.bf16.msra.mxu0 %v3356_v8  ;;  %3363 = vmatpush3.bf16.msra.mxu1 %v3362_v13 }
 0x60d   : > { %3104 = vmatprep.subr.mxu0 %v3556_v0  ;;  %v2049_v0 = vld [vmem:[%s4428_s10] sm:$0x1] }
 0x610   : > { %3105 = vmatpush3.msra.mxu0 %v2788_v9 }
 0x611   : > { %3107 = vmatmul.mubr.msk.f32.vlgmr.msra.gmra.mrb[16].mxu0 %vm2055_vm14, %v2376_v10 }
 0x6e4   : > { %v2445_v14 = vpop.f32.mrb[16].mxu0 }
 0x6e5   : > { %v3364_v15 = vadd.f32 %v2445_v14, %v2049_v0  ;;  %v3108_v16 = vpop.f32.mrb[17].mxu0 }
 0x6e7   : > { %v2450_v17 = vmax.f32 %v3364_v15, 0.0 }
 0x6e9   : > { %3118 = vmatmul.mubr.msk.f32.vlgmr.msra.gmra.mrb[16].mxu1 %vm2456_vm15, %v2450_v17 }
 0x7bc   : > { %v2526_v19 = vpop.f32.mrb[16].mxu1 }
 0x7bd   : > { %v2527_v20 = vadd.f32 %v2526_v19, %v2455_v18  ;;  %v3119_v21 = vpop.f32.mrb[17].mxu1 }
 0x7bf   : > { %v2531_v22 = vsel %vm2530_vm0, %v2527_v20, -inf }
 0x7c0   : > { %2532 = vmax.xlane.f32.xlu0 %v2531_v22 }
 0x84d   : > { %v2533_v23 = vpop.xlane.xlu0 %2532 }
 0x84e   : > { %v2534_v24 = vsub.f32 %v2527_v20, %v2533_v23 }
 0x850   : > { %v2535_v25 = vmul.f32 1.442695, %v2534_v24 }
 0x852   : > { %3455 = vpow2.f32 %v2535_v25 }
 0x85c   : > { %v3456_v26 = vpop.eup %3455 }
 0x85d   : > { %v2537_v27 = vsel %vm2530_vm0, %v3456_v26, 0.0 }
 0x85e   : > { %2538 = vadd.xlane.f32.xlu0 %v2537_v27 }
 0x8eb   : > { %v2539_v28 = vpop.xlane.xlu0 %2538 }
 0x8ec   : > { %3457 = vrcp.f32 %v2539_v28 }
 0x8f6   : > { %v3458_v29 = vpop.eup %3457 }
 0x8f7   : > { %v2541_v30 = vmul.f32 %v3458_v29, %v2539_v28 }
 0x8f9   : > { %v2542_v31 = vsub.f32 2.0, %v2541_v30 }
 0x8fb   : > { %v2543_v32 = vmul.f32 %v3458_v29, %v2542_v31 }
 0x8fd   : > { %v2544_v33 = vmul.f32 %v3456_v26, %v2543_v32 }
 0x8ff   : > { %2545 = vst.msk [vmem:[%s445_s20] sm:$0x1] %vm2530_vm0, %v2544_v33 }
 0x900   : > { %3500 = shalt.err (!%p3497_p7)
}
 0x901   : > { %s3501_s24 = scalar_lea.hbm %s4375_s2, 16  ;;  %s3505_s27 = scalar_lea.hbm %s4431_s13, 32 }
 0x902   : > { %p3502_p8 = scmp.ne.s32.totalorder %s4375_s2, %s3501_s24  ;;  %p3506_p1 = scmp.lt.u32.totalorder %s4375_s2, %s4431_s13 }
 0x903   : > { %p3507_p0 = scmp.lt.u32.totalorder %s3505_s27, %s3501_s24  ;;  %p3509_p6 = scmp.lt.u32.totalorder %s3501_s24, %s4375_s2 }
 0x904   : > { %p3503_p11 = pnand %p3502_p8, %p4454_p9 }
 0x905   : > { %p3508_p5 = por %p3507_p0, %p3506_p1 }
 0x906   : > { %p3504_p13 = pneg %p3503_p11 }
 0x907   : > { %p3510_p10 = por %p3509_p6, %p3508_p5 }
 0x909   : > { %p3511_p12 = pnand %p3510_p10, %p3504_p13 }
 0x90b   : > { %3514 = shalt.err (!%p3511_p12)
}
 0x90c   : > { %3405 = dma.vmem_to_hbm [thread:$0]  (%p4454_p9), %s4377_s22, 16, %s4375_s2, %s2547_s16  }
 0x90d PF: > { %p3417_p2 = scmp.ge.s32.totalorder %s3553_s28, 2  ;;  %s2571_s30 = sand.u32 1, %s3541_s25  }
 0x90e   : > { %p4455_p3 = scmp.ne.s32.totalorder %s4444_s19, 0  ;;  %s2572_s21 = scalar_lea.sflag [#allocation4], %s2571_s30 }
 0x910   : > { %p3412_p4 = pnand %p3417_p2, %p4455_p3 }
 0x912   : > { %3536 = dma.done.wait (!%p3412_p4), %s2572_s21, 16  }
 0x913   : > { %3538 = vsyncadd (!%p3412_p4), %s2572_s21, 4294967280  ;;  %s4456_s28 = sld [smem:[#allocation9_spill]]  ;;  %s4457_s29 = sld [smem:[#allocation8_spill]] }
 0x914   : > { %s4458_s27 = sld [smem:[#allocation10_spill]]  ;;  %s4459_s25 = smov %s3545_s26 }
 0x919   : > { %p24_p7 = scmp.ge.s32.totalorder %s4456_s28, 4   ;;  %s4460_s26 = smov %s4457_s29 }
 0x91b   :  { %26 = sbr.rel (!%p24_p7) target bundleno = 7 (0x7), region = 126 }
 0x922   :  { %2576 = vsyncpa [#allocation3], 1 }
 0x923   :  { %2578 = vsyncpa [#allocation3 + $0x1], 1 }
 0x924   :  { %2579 = vsyncpa [#allocation4], 1 }
 0x925   :  { %2581 = vsyncpa [#allocation4 + $0x1], 1 }

</bundles_post_ra>
